<compile_context>
chip_gen: v5e
topology: v5e:2x2
jax: 0.10.0
libtpu: 0.0.40
codegen_flags: <defaults>
</compile_context>

<pallas_src>
import functools

import numpy as np
import jax
import jax.numpy as jnp
from jax import lax
from jax.experimental import pallas as pl
from jax.experimental.pallas import tpu as pltpu

ALPHA = 0.85
WINDOW_SIZE = 11
SIGMA = 1.5
VAL_RANGE = 1.0
C1 = (0.01 * VAL_RANGE) ** 2
C2 = (0.03 * VAL_RANGE) ** 2


def _gaussian_1d(window_size, sigma):
    xs = np.arange(window_size, dtype=np.float64)
    g = np.exp(-((xs - window_size // 2) ** 2) / (2.0 * sigma ** 2))
    return (g / g.sum()).astype(np.float32)


def ap_loss_kernel(t_ref, w_ref, o_ref, *, taps, win, h, w, cb, mxu_bf16):
    """One grid step = `cb` channels, row-stacked as a (cb*h, w) slab."""
    f32 = jnp.float32
    t = t_ref[...].astype(f32)                        # (cb*h, w)
    wr = w_ref[...].astype(f32)

    # ---- photometric L1 partial sum --------------------------------------
    diff_sum = jnp.sum(jnp.abs(wr - t))

    # ---- gradient L1 partial sums -----------------------------------------
    # Replicate padding => last gradient column / per-channel last row is 0,
    # so those positions are simply excluded from the partial sums.
    gx_t = jnp.abs(t[:, :-1] - t[:, 1:])
    gx_w = jnp.abs(wr[:, :-1] - wr[:, 1:])
    gx_sum = jnp.sum(jnp.abs(gx_w - gx_t))

    gy_t = jnp.abs(t[:-1, :] - t[1:, :])
    gy_w = jnp.abs(wr[:-1, :] - wr[1:, :])
    gy = jnp.abs(gy_w - gy_t)                         # (cb*h - 1, w)
    if cb > 1:
        # Rows at channel boundaries mix two channels -> mask them out
        # (they correspond to the replicate-pad zero rows anyway).
        rows = lax.broadcasted_iota(jnp.int32, gy.shape, 0)
        bad = rows == (h - 1)
        for k in range(2, cb):
            bad = bad | (rows == (k * h - 1))
        gy = jnp.where(bad, 0.0, gy)
    gy_sum = jnp.sum(gy)

    # ---- SSIM partial sum --------------------------------------------------
    hc = h - win + 1
    wc = w - win + 1

    # Band matrices built in-kernel from the compile-time Gaussian taps (no
    # HBM constants, no double-buffered VMEM copies).  VALID separable conv:
    #   filtered = Gv @ X @ Gh   with Gv (hc,h), Gh (w,wc).
    r_gh = lax.broadcasted_iota(jnp.int32, (w, wc), 0)
    c_gh = lax.broadcasted_iota(jnp.int32, (w, wc), 1)
    gh = jnp.zeros((w, wc), f32)
    for k in range(win):
        gh = jnp.where(r_gh - c_gh == k, taps[k], gh)

    r_gv = lax.broadcasted_iota(jnp.int32, (hc, h), 0)
    c_gv = lax.broadcasted_iota(jnp.int32, (hc, h), 1)
    gv = jnp.zeros((hc, h), f32)
    for k in range(win):
        gv = jnp.where(c_gv - r_gv == k, taps[k], gv)

    # Fused horizontal pass: all 5 maps x cb channels in ONE MXU call.
    slab = jnp.concatenate([wr, t, wr * t, wr * wr, t * t], axis=0)  # (5*cb*h, w)
    if mxu_bf16:
        hp = jnp.dot(slab.astype(jnp.bfloat16), gh.astype(jnp.bfloat16),
                     preferred_element_type=f32)
        gv_mm = gv.astype(jnp.bfloat16)
    else:
        hp = jnp.dot(slab, gh, preferred_element_type=f32)           # (5*cb*h, wc)
        gv_mm = gv

    def vfilt(map_idx, ch):
        start = (map_idx * cb + ch) * h               # multiple of h (h % 8 == 0)
        blk = hp[start:start + h, :]
        if mxu_bf16:
            blk = blk.astype(jnp.bfloat16)
        return jnp.dot(gv_mm, blk, preferred_element_type=f32)       # (hc, wc)

    ssim_sum = jnp.float32(0.0)
    for ch in range(cb):
        mu1, mu2 = vfilt(0, ch), vfilt(1, ch)
        f12, f11, f22 = vfilt(2, ch), vfilt(3, ch), vfilt(4, ch)
        mu1mu2 = mu1 * mu2
        mu1sq = mu1 * mu1
        mu2sq = mu2 * mu2
        s12 = f12 - mu1mu2
        s11 = f11 - mu1sq
        s22 = f22 - mu2sq
        num = (2.0 * mu1mu2 + C1) * (2.0 * s12 + C2)
        den = (mu1sq + mu2sq + C1) * (s11 + s22 + C2)
        # Exact division kept (approx reciprocal rejected for the tolerance).
        ssim_sum = ssim_sum + jnp.sum(num / den)

    # ---- lane-dense per-step partial-sum output ----------------------------
    lane = lax.broadcasted_iota(jnp.int32, (1, 8, 128), 2)
    part = (jnp.where(lane == 0, diff_sum, 0.0)
            + jnp.where(lane == 1, gx_sum, 0.0)
            + jnp.where(lane == 2, gy_sum, 0.0)
            + jnp.where(lane == 3, ssim_sum, 0.0))
    o_ref[...] = part.astype(jnp.float32)


def _step_vmem_bytes(cb, h, w, hc, wc, in_itemsize):
    """Honest per-grid-step VMEM estimate for a channel batch of size cb."""
    inputs = 2 * 2 * cb * h * w * in_itemsize         # 2 tensors, double-buffered
    outputs = 2 * 8 * 128 * 4
    work = (16 * cb * h * w                           # f32 copies, products, slab, grad temps
            + 5 * cb * h * wc                         # fused horizontal-pass result
            + hc * h + w * wc                         # in-kernel band matrices
            + 8 * hc * wc) * 4                        # per-channel SSIM epilogue maps
    return inputs + outputs + work


def _pick_cb(nc, h, w, hc, wc, in_itemsize, budget):
    """Largest channel batch dividing nc that keeps >= 2 grid steps (megacore /
    v7x dual-TC) and fits the per-step VMEM budget."""
    if h % 8 != 0:
        # Block rows must stay a multiple of 8 (or the full extent).
        # TODO(synk): 3-D (1,h,w) block fallback for h not a multiple of 8.
        return nc
    best = 1
    for cb in range(1, nc + 1):
        if nc % cb:
            continue
        if nc >= 2 and nc // cb < 2:
            continue
        if _step_vmem_bytes(cb, h, w, hc, wc, in_itemsize) > budget:
            continue
        best = cb
    return best


def ap_loss(disp, target_img, wrap_img, alpha=ALPHA, mxu_bf16=False):
    """Pallas implementation of AP_Loss.forward. `disp` is unused (parity)."""
    del disp
    n, c, h, w = target_img.shape
    nc = n * c
    win = min(WINDOW_SIZE, h, w)                      # real_size = min(11, H, W)
    hc, wc = h - win + 1, w - win + 1
    taps = tuple(float(v) for v in _gaussian_1d(win, SIGMA))

    # Channels row-stacked into a lane-dense (nc*h, w) slab: the kernel works
    # in 2-D with no in-kernel reshapes.
    t2d = jnp.asarray(target_img).reshape(nc * h, w)
    w2d = jnp.asarray(wrap_img).reshape(nc * h, w)

    # ---- honest VMEM budget ------------------------------------------------
    try:
        phys_vmem = int(pltpu.get_tpu_info().vmem_capacity_bytes)
    except Exception:
        phys_vmem = 64 * 1024 * 1024                  # v7x per-TC worst case
    vmem_cap = (phys_vmem * 3) // 4                   # ~48 MiB v7x, ~96 MiB v5e/v6e
    cb = _pick_cb(nc, h, w, hc, wc, t2d.dtype.itemsize,
                  budget=min(vmem_cap, 48 * 1024 * 1024))
    steps = nc // cb
    need = _step_vmem_bytes(cb, h, w, hc, wc, t2d.dtype.itemsize)
    vmem_limit = int(min(vmem_cap, max(32 * 1024 * 1024, need + need // 4)))

    kernel = functools.partial(ap_loss_kernel, taps=taps, win=win, h=h, w=w,
                               cb=cb, mxu_bf16=mxu_bf16)
    out = pl.pallas_call(
        kernel,
        out_shape=jax.ShapeDtypeStruct((steps, 8, 128), jnp.float32),
        grid=(steps,),
        in_specs=[
            pl.BlockSpec((cb * h, w), lambda i: (i, 0)),   # target channels
            pl.BlockSpec((cb * h, w), lambda i: (i, 0)),   # wrap channels
        ],
        out_specs=pl.BlockSpec((1, 8, 128), lambda i: (i, 0, 0)),
        compiler_params=pltpu.CompilerParams(
            dimension_semantics=("parallel",),
            vmem_limit_bytes=vmem_limit),
    )(t2d, w2d)

    # Final scalar combine (tiny) outside the kernel.
    sums = jnp.sum(out[:, 0, :4], axis=0)             # (4,) per-term totals
    n_total = float(nc * h * w)
    l1 = sums[0] / n_total
    l1_gx = sums[1] / n_total
    l1_gy = sums[2] / n_total
    ssim_val = sums[3] / float(nc * hc * wc)
    loss = alpha * (1.0 - ssim_val) * 0.5 + (1.0 - alpha) * (l1 + l1_gx + l1_gy)
    return loss


# ---------------- float64 NumPy reference (for correctness check) ----------
def _ap_loss_ref_np(target_img, wrap_img, alpha=ALPHA):
    t = np.asarray(target_img, np.float64)
    w = np.asarray(wrap_img, np.float64)
    n, c, H, W = t.shape
    n_total = n * c * H * W

    l1 = np.abs(w - t).sum() / n_total
    gx_t = np.abs(t[..., :, :-1] - t[..., :, 1:])
    gx_w = np.abs(w[..., :, :-1] - w[..., :, 1:])
    l1_gx = np.abs(gx_w - gx_t).sum() / n_total
    gy_t = np.abs(t[..., :-1, :] - t[..., 1:, :])
    gy_w = np.abs(w[..., :-1, :] - w[..., 1:, :])
    l1_gy = np.abs(gy_w - gy_t).sum() / n_total

    win = min(WINDOW_SIZE, H, W)
    g = _gaussian_1d(win, SIGMA).astype(np.float64)
    Hc, Wc = H - win + 1, W - win + 1

    def gfilter(m):
        v = sum(g[k] * m[..., k:k + Hc, :] for k in range(win))
        return sum(g[k] * v[..., :, k:k + Wc] for k in range(win))

    mu1, mu2 = gfilter(w), gfilter(t)
    s1 = gfilter(w * w) - mu1 * mu1
    s2 = gfilter(t * t) - mu2 * mu2
    s12 = gfilter(w * t) - mu1 * mu2
    ssim_map = ((2 * mu1 * mu2 + C1) * (2 * s12 + C2)) / (
        (mu1 * mu1 + mu2 * mu2 + C1) * (s1 + s2 + C2))
    ssim_val = ssim_map.mean()
    return alpha * (1.0 - ssim_val) / 2.0 + (1.0 - alpha) * (l1 + l1_gx + l1_gy)


if __name__ == "__main__":
    key = jax.random.PRNGKey(0)
    k1, k2, k3 = jax.random.split(key, 3)
    N, C, H, W = 2, 3, 16, 16
    disp = jax.random.uniform(k1, (N, 1, H, W), jnp.float32)      # unused by forward
    target_img = jax.random.uniform(k2, (N, C, H, W), jnp.float32)
    wrap_img = jax.random.uniform(k3, (N, C, H, W), jnp.float32)

    loss = ap_loss(disp, target_img, wrap_img, alpha=ALPHA)
    loss = jax.block_until_ready(loss)

    ref = _ap_loss_ref_np(np.asarray(target_img), np.asarray(wrap_img), alpha=ALPHA)
    np.testing.assert_allclose(np.asarray(loss), ref, rtol=2e-3, atol=2e-4)
    print("KERNEL_OK")
</pallas_src>

<mosaic_0001>
module attributes {stable_mosaic.version = 11 : i64} {
  func.func @ap_loss_kernel(%arg0: i32, %arg1: memref<48x16xf32, #tpu.memory_space<vmem>>, %arg2: memref<48x16xf32, #tpu.memory_space<vmem>>, %arg3: memref<1x8x128xf32, #tpu.memory_space<vmem>>) attributes {dimension_semantics = [#tpu.dimension_semantics<parallel>], iteration_bounds = array<i64: 2>, scalar_prefetch = 0 : i64, scratch_operands = 0 : i64, tpu.core_type = #tpu.core_type<tc>, window_params = [{transform_indices = @transform_0, window_bounds = array<i64: 48, 16>}, {transform_indices = @transform_1, window_bounds = array<i64: 48, 16>}, {transform_indices = @transform_2, window_bounds = array<i64: 1, 8, 128>}]} {
    %c0 = arith.constant 0 : index
    %c0_0 = arith.constant 0 : index
    %0 = vector.load %arg1[%c0, %c0_0] : memref<48x16xf32, #tpu.memory_space<vmem>>, vector<48x16xf32>
    %c0_1 = arith.constant 0 : index
    %c0_2 = arith.constant 0 : index
    %1 = vector.load %arg2[%c0_1, %c0_2] : memref<48x16xf32, #tpu.memory_space<vmem>>, vector<48x16xf32>
    %2 = arith.subf %1, %0 : vector<48x16xf32>
    %3 = math.absf %2 : vector<48x16xf32>
    %4 = vector.shape_cast %3 : vector<48x16xf32> to vector<1x48x16xf32>
    %cst = arith.constant dense<0.000000e+00> : vector<1xf32>
    %5 = vector.multi_reduction <add>, %4, %cst [1, 2] : vector<1x48x16xf32> to vector<1xf32>
    %6 = vector.shape_cast %5 : vector<1xf32> to vector<1x1x1xf32>
    %7 = vector.extract %6[0, 0, 0] : f32 from vector<1x1x1xf32>
    %8 = vector.extract_strided_slice %0 {offsets = [0, 0], sizes = [48, 15], strides = [1, 1]} : vector<48x16xf32> to vector<48x15xf32>
    %9 = vector.extract_strided_slice %0 {offsets = [0, 1], sizes = [48, 15], strides = [1, 1]} : vector<48x16xf32> to vector<48x15xf32>
    %10 = arith.subf %8, %9 : vector<48x15xf32>
    %11 = math.absf %10 : vector<48x15xf32>
    %12 = vector.extract_strided_slice %1 {offsets = [0, 0], sizes = [48, 15], strides = [1, 1]} : vector<48x16xf32> to vector<48x15xf32>
    %13 = vector.extract_strided_slice %1 {offsets = [0, 1], sizes = [48, 15], strides = [1, 1]} : vector<48x16xf32> to vector<48x15xf32>
    %14 = arith.subf %12, %13 : vector<48x15xf32>
    %15 = math.absf %14 : vector<48x15xf32>
    %16 = arith.subf %15, %11 : vector<48x15xf32>
    %17 = math.absf %16 : vector<48x15xf32>
    %18 = vector.shape_cast %17 : vector<48x15xf32> to vector<1x48x15xf32>
    %cst_3 = arith.constant dense<0.000000e+00> : vector<1xf32>
    %19 = vector.multi_reduction <add>, %18, %cst_3 [1, 2] : vector<1x48x15xf32> to vector<1xf32>
    %20 = vector.shape_cast %19 : vector<1xf32> to vector<1x1x1xf32>
    %21 = vector.extract %20[0, 0, 0] : f32 from vector<1x1x1xf32>
    %22 = vector.extract_strided_slice %0 {offsets = [0, 0], sizes = [47, 16], strides = [1, 1]} : vector<48x16xf32> to vector<47x16xf32>
    %23 = vector.extract_strided_slice %0 {offsets = [1, 0], sizes = [47, 16], strides = [1, 1]} : vector<48x16xf32> to vector<47x16xf32>
    %24 = arith.subf %22, %23 : vector<47x16xf32>
    %25 = math.absf %24 : vector<47x16xf32>
    %26 = vector.extract_strided_slice %1 {offsets = [0, 0], sizes = [47, 16], strides = [1, 1]} : vector<48x16xf32> to vector<47x16xf32>
    %27 = vector.extract_strided_slice %1 {offsets = [1, 0], sizes = [47, 16], strides = [1, 1]} : vector<48x16xf32> to vector<47x16xf32>
    %28 = arith.subf %26, %27 : vector<47x16xf32>
    %29 = math.absf %28 : vector<47x16xf32>
    %30 = arith.subf %29, %25 : vector<47x16xf32>
    %31 = math.absf %30 : vector<47x16xf32>
    %32 = tpu.iota {dimensions = array<i32: 0>} : vector<47x16xi32>
    %c15_i32 = arith.constant 15 : i32
    %33 = vector.broadcast %c15_i32 : i32 to vector<47x16xi32>
    %34 = arith.cmpi eq, %32, %33 : vector<47x16xi32>
    %c31_i32 = arith.constant 31 : i32
    %35 = vector.broadcast %c31_i32 : i32 to vector<47x16xi32>
    %36 = arith.cmpi eq, %32, %35 : vector<47x16xi32>
    %37 = arith.ori %34, %36 : vector<47x16xi1>
    %cst_4 = arith.constant 0.000000e+00 : f32
    %38 = vector.broadcast %cst_4 : f32 to vector<47x16xf32>
    %39 = arith.select %37, %38, %31 : vector<47x16xi1>, vector<47x16xf32>
    %40 = vector.shape_cast %39 : vector<47x16xf32> to vector<1x47x16xf32>
    %cst_5 = arith.constant dense<0.000000e+00> : vector<1xf32>
    %41 = vector.multi_reduction <add>, %40, %cst_5 [1, 2] : vector<1x47x16xf32> to vector<1xf32>
    %42 = vector.shape_cast %41 : vector<1xf32> to vector<1x1x1xf32>
    %43 = vector.extract %42[0, 0, 0] : f32 from vector<1x1x1xf32>
    %44 = tpu.iota {dimensions = array<i32: 0>} : vector<16x6xi32>
    %45 = tpu.iota {dimensions = array<i32: 1>} : vector<16x6xi32>
    %cst_6 = arith.constant 0.000000e+00 : f32
    %46 = vector.broadcast %cst_6 : f32 to vector<16x6xf32>
    %47 = arith.subi %44, %45 : vector<16x6xi32>
    %c0_i32 = arith.constant 0 : i32
    %48 = vector.broadcast %c0_i32 : i32 to vector<16x6xi32>
    %49 = arith.cmpi eq, %47, %48 : vector<16x6xi32>
    %cst_7 = arith.constant 0.00102838012 : f32
    %50 = vector.broadcast %cst_7 : f32 to vector<16x6xf32>
    %51 = arith.select %49, %50, %46 : vector<16x6xi1>, vector<16x6xf32>
    %52 = arith.subi %44, %45 : vector<16x6xi32>
    %c1_i32 = arith.constant 1 : i32
    %53 = vector.broadcast %c1_i32 : i32 to vector<16x6xi32>
    %54 = arith.cmpi eq, %52, %53 : vector<16x6xi32>
    %cst_8 = arith.constant 0.00759875821 : f32
    %55 = vector.broadcast %cst_8 : f32 to vector<16x6xf32>
    %56 = arith.select %54, %55, %51 : vector<16x6xi1>, vector<16x6xf32>
    %57 = arith.subi %44, %45 : vector<16x6xi32>
    %c2_i32 = arith.constant 2 : i32
    %58 = vector.broadcast %c2_i32 : i32 to vector<16x6xi32>
    %59 = arith.cmpi eq, %57, %58 : vector<16x6xi32>
    %cst_9 = arith.constant 0.0360007733 : f32
    %60 = vector.broadcast %cst_9 : f32 to vector<16x6xf32>
    %61 = arith.select %59, %60, %56 : vector<16x6xi1>, vector<16x6xf32>
    %62 = arith.subi %44, %45 : vector<16x6xi32>
    %c3_i32 = arith.constant 3 : i32
    %63 = vector.broadcast %c3_i32 : i32 to vector<16x6xi32>
    %64 = arith.cmpi eq, %62, %63 : vector<16x6xi32>
    %cst_10 = arith.constant 0.109360687 : f32
    %65 = vector.broadcast %cst_10 : f32 to vector<16x6xf32>
    %66 = arith.select %64, %65, %61 : vector<16x6xi1>, vector<16x6xf32>
    %67 = arith.subi %44, %45 : vector<16x6xi32>
    %c4_i32 = arith.constant 4 : i32
    %68 = vector.broadcast %c4_i32 : i32 to vector<16x6xi32>
    %69 = arith.cmpi eq, %67, %68 : vector<16x6xi32>
    %cst_11 = arith.constant 0.213005543 : f32
    %70 = vector.broadcast %cst_11 : f32 to vector<16x6xf32>
    %71 = arith.select %69, %70, %66 : vector<16x6xi1>, vector<16x6xf32>
    %72 = arith.subi %44, %45 : vector<16x6xi32>
    %c5_i32 = arith.constant 5 : i32
    %73 = vector.broadcast %c5_i32 : i32 to vector<16x6xi32>
    %74 = arith.cmpi eq, %72, %73 : vector<16x6xi32>
    %cst_12 = arith.constant 0.266011715 : f32
    %75 = vector.broadcast %cst_12 : f32 to vector<16x6xf32>
    %76 = arith.select %74, %75, %71 : vector<16x6xi1>, vector<16x6xf32>
    %77 = arith.subi %44, %45 : vector<16x6xi32>
    %c6_i32 = arith.constant 6 : i32
    %78 = vector.broadcast %c6_i32 : i32 to vector<16x6xi32>
    %79 = arith.cmpi eq, %77, %78 : vector<16x6xi32>
    %cst_13 = arith.constant 0.213005543 : f32
    %80 = vector.broadcast %cst_13 : f32 to vector<16x6xf32>
    %81 = arith.select %79, %80, %76 : vector<16x6xi1>, vector<16x6xf32>
    %82 = arith.subi %44, %45 : vector<16x6xi32>
    %c7_i32 = arith.constant 7 : i32
    %83 = vector.broadcast %c7_i32 : i32 to vector<16x6xi32>
    %84 = arith.cmpi eq, %82, %83 : vector<16x6xi32>
    %cst_14 = arith.constant 0.109360687 : f32
    %85 = vector.broadcast %cst_14 : f32 to vector<16x6xf32>
    %86 = arith.select %84, %85, %81 : vector<16x6xi1>, vector<16x6xf32>
    %87 = arith.subi %44, %45 : vector<16x6xi32>
    %c8_i32 = arith.constant 8 : i32
    %88 = vector.broadcast %c8_i32 : i32 to vector<16x6xi32>
    %89 = arith.cmpi eq, %87, %88 : vector<16x6xi32>
    %cst_15 = arith.constant 0.0360007733 : f32
    %90 = vector.broadcast %cst_15 : f32 to vector<16x6xf32>
    %91 = arith.select %89, %90, %86 : vector<16x6xi1>, vector<16x6xf32>
    %92 = arith.subi %44, %45 : vector<16x6xi32>
    %c9_i32 = arith.constant 9 : i32
    %93 = vector.broadcast %c9_i32 : i32 to vector<16x6xi32>
    %94 = arith.cmpi eq, %92, %93 : vector<16x6xi32>
    %cst_16 = arith.constant 0.00759875821 : f32
    %95 = vector.broadcast %cst_16 : f32 to vector<16x6xf32>
    %96 = arith.select %94, %95, %91 : vector<16x6xi1>, vector<16x6xf32>
    %97 = arith.subi %44, %45 : vector<16x6xi32>
    %c10_i32 = arith.constant 10 : i32
    %98 = vector.broadcast %c10_i32 : i32 to vector<16x6xi32>
    %99 = arith.cmpi eq, %97, %98 : vector<16x6xi32>
    %cst_17 = arith.constant 0.00102838012 : f32
    %100 = vector.broadcast %cst_17 : f32 to vector<16x6xf32>
    %101 = arith.select %99, %100, %96 : vector<16x6xi1>, vector<16x6xf32>
    %102 = tpu.iota {dimensions = array<i32: 0>} : vector<6x16xi32>
    %103 = tpu.iota {dimensions = array<i32: 1>} : vector<6x16xi32>
    %cst_18 = arith.constant 0.000000e+00 : f32
    %104 = vector.broadcast %cst_18 : f32 to vector<6x16xf32>
    %105 = arith.subi %103, %102 : vector<6x16xi32>
    %c0_i32_19 = arith.constant 0 : i32
    %106 = vector.broadcast %c0_i32_19 : i32 to vector<6x16xi32>
    %107 = arith.cmpi eq, %105, %106 : vector<6x16xi32>
    %cst_20 = arith.constant 0.00102838012 : f32
    %108 = vector.broadcast %cst_20 : f32 to vector<6x16xf32>
    %109 = arith.select %107, %108, %104 : vector<6x16xi1>, vector<6x16xf32>
    %110 = arith.subi %103, %102 : vector<6x16xi32>
    %c1_i32_21 = arith.constant 1 : i32
    %111 = vector.broadcast %c1_i32_21 : i32 to vector<6x16xi32>
    %112 = arith.cmpi eq, %110, %111 : vector<6x16xi32>
    %cst_22 = arith.constant 0.00759875821 : f32
    %113 = vector.broadcast %cst_22 : f32 to vector<6x16xf32>
    %114 = arith.select %112, %113, %109 : vector<6x16xi1>, vector<6x16xf32>
    %115 = arith.subi %103, %102 : vector<6x16xi32>
    %c2_i32_23 = arith.constant 2 : i32
    %116 = vector.broadcast %c2_i32_23 : i32 to vector<6x16xi32>
    %117 = arith.cmpi eq, %115, %116 : vector<6x16xi32>
    %cst_24 = arith.constant 0.0360007733 : f32
    %118 = vector.broadcast %cst_24 : f32 to vector<6x16xf32>
    %119 = arith.select %117, %118, %114 : vector<6x16xi1>, vector<6x16xf32>
    %120 = arith.subi %103, %102 : vector<6x16xi32>
    %c3_i32_25 = arith.constant 3 : i32
    %121 = vector.broadcast %c3_i32_25 : i32 to vector<6x16xi32>
    %122 = arith.cmpi eq, %120, %121 : vector<6x16xi32>
    %cst_26 = arith.constant 0.109360687 : f32
    %123 = vector.broadcast %cst_26 : f32 to vector<6x16xf32>
    %124 = arith.select %122, %123, %119 : vector<6x16xi1>, vector<6x16xf32>
    %125 = arith.subi %103, %102 : vector<6x16xi32>
    %c4_i32_27 = arith.constant 4 : i32
    %126 = vector.broadcast %c4_i32_27 : i32 to vector<6x16xi32>
    %127 = arith.cmpi eq, %125, %126 : vector<6x16xi32>
    %cst_28 = arith.constant 0.213005543 : f32
    %128 = vector.broadcast %cst_28 : f32 to vector<6x16xf32>
    %129 = arith.select %127, %128, %124 : vector<6x16xi1>, vector<6x16xf32>
    %130 = arith.subi %103, %102 : vector<6x16xi32>
    %c5_i32_29 = arith.constant 5 : i32
    %131 = vector.broadcast %c5_i32_29 : i32 to vector<6x16xi32>
    %132 = arith.cmpi eq, %130, %131 : vector<6x16xi32>
    %cst_30 = arith.constant 0.266011715 : f32
    %133 = vector.broadcast %cst_30 : f32 to vector<6x16xf32>
    %134 = arith.select %132, %133, %129 : vector<6x16xi1>, vector<6x16xf32>
    %135 = arith.subi %103, %102 : vector<6x16xi32>
    %c6_i32_31 = arith.constant 6 : i32
    %136 = vector.broadcast %c6_i32_31 : i32 to vector<6x16xi32>
    %137 = arith.cmpi eq, %135, %136 : vector<6x16xi32>
    %cst_32 = arith.constant 0.213005543 : f32
    %138 = vector.broadcast %cst_32 : f32 to vector<6x16xf32>
    %139 = arith.select %137, %138, %134 : vector<6x16xi1>, vector<6x16xf32>
    %140 = arith.subi %103, %102 : vector<6x16xi32>
    %c7_i32_33 = arith.constant 7 : i32
    %141 = vector.broadcast %c7_i32_33 : i32 to vector<6x16xi32>
    %142 = arith.cmpi eq, %140, %141 : vector<6x16xi32>
    %cst_34 = arith.constant 0.109360687 : f32
    %143 = vector.broadcast %cst_34 : f32 to vector<6x16xf32>
    %144 = arith.select %142, %143, %139 : vector<6x16xi1>, vector<6x16xf32>
    %145 = arith.subi %103, %102 : vector<6x16xi32>
    %c8_i32_35 = arith.constant 8 : i32
    %146 = vector.broadcast %c8_i32_35 : i32 to vector<6x16xi32>
    %147 = arith.cmpi eq, %145, %146 : vector<6x16xi32>
    %cst_36 = arith.constant 0.0360007733 : f32
    %148 = vector.broadcast %cst_36 : f32 to vector<6x16xf32>
    %149 = arith.select %147, %148, %144 : vector<6x16xi1>, vector<6x16xf32>
    %150 = arith.subi %103, %102 : vector<6x16xi32>
    %c9_i32_37 = arith.constant 9 : i32
    %151 = vector.broadcast %c9_i32_37 : i32 to vector<6x16xi32>
    %152 = arith.cmpi eq, %150, %151 : vector<6x16xi32>
    %cst_38 = arith.constant 0.00759875821 : f32
    %153 = vector.broadcast %cst_38 : f32 to vector<6x16xf32>
    %154 = arith.select %152, %153, %149 : vector<6x16xi1>, vector<6x16xf32>
    %155 = arith.subi %103, %102 : vector<6x16xi32>
    %c10_i32_39 = arith.constant 10 : i32
    %156 = vector.broadcast %c10_i32_39 : i32 to vector<6x16xi32>
    %157 = arith.cmpi eq, %155, %156 : vector<6x16xi32>
    %cst_40 = arith.constant 0.00102838012 : f32
    %158 = vector.broadcast %cst_40 : f32 to vector<6x16xf32>
    %159 = arith.select %157, %158, %154 : vector<6x16xi1>, vector<6x16xf32>
    %160 = arith.mulf %1, %0 : vector<48x16xf32>
    %161 = arith.mulf %1, %1 : vector<48x16xf32>
    %162 = arith.mulf %0, %0 : vector<48x16xf32>
    %163 = tpu.concatenate %1, %0, %160, %161, %162 in 0 : vector<48x16xf32>, vector<48x16xf32>, vector<48x16xf32>, vector<48x16xf32>, vector<48x16xf32> -> vector<240x16xf32>
    %cst_41 = arith.constant dense<0.000000e+00> : vector<240x6xf32>
    %164 = tpu.matmul %163, %101, %cst_41 {dimension_numbers = #tpu.dot_dimension_numbers<[1], [0], [0], [1], [0, 0, 1, 1], [], []>} : vector<240x16xf32>, vector<16x6xf32>, vector<240x6xf32> -> vector<240x6xf32>
    %165 = vector.extract_strided_slice %164 {offsets = [0, 0], sizes = [16, 6], strides = [1, 1]} : vector<240x6xf32> to vector<16x6xf32>
    %cst_42 = arith.constant dense<0.000000e+00> : vector<6x6xf32>
    %166 = tpu.matmul %159, %165, %cst_42 {dimension_numbers = #tpu.dot_dimension_numbers<[1], [0], [0], [1], [0, 0, 1, 1], [], []>} : vector<6x16xf32>, vector<16x6xf32>, vector<6x6xf32> -> vector<6x6xf32>
    %167 = vector.extract_strided_slice %164 {offsets = [48, 0], sizes = [16, 6], strides = [1, 1]} : vector<240x6xf32> to vector<16x6xf32>
    %cst_43 = arith.constant dense<0.000000e+00> : vector<6x6xf32>
    %168 = tpu.matmul %159, %167, %cst_43 {dimension_numbers = #tpu.dot_dimension_numbers<[1], [0], [0], [1], [0, 0, 1, 1], [], []>} : vector<6x16xf32>, vector<16x6xf32>, vector<6x6xf32> -> vector<6x6xf32>
    %169 = vector.extract_strided_slice %164 {offsets = [96, 0], sizes = [16, 6], strides = [1, 1]} : vector<240x6xf32> to vector<16x6xf32>
    %cst_44 = arith.constant dense<0.000000e+00> : vector<6x6xf32>
    %170 = tpu.matmul %159, %169, %cst_44 {dimension_numbers = #tpu.dot_dimension_numbers<[1], [0], [0], [1], [0, 0, 1, 1], [], []>} : vector<6x16xf32>, vector<16x6xf32>, vector<6x6xf32> -> vector<6x6xf32>
    %171 = vector.extract_strided_slice %164 {offsets = [144, 0], sizes = [16, 6], strides = [1, 1]} : vector<240x6xf32> to vector<16x6xf32>
    %cst_45 = arith.constant dense<0.000000e+00> : vector<6x6xf32>
    %172 = tpu.matmul %159, %171, %cst_45 {dimension_numbers = #tpu.dot_dimension_numbers<[1], [0], [0], [1], [0, 0, 1, 1], [], []>} : vector<6x16xf32>, vector<16x6xf32>, vector<6x6xf32> -> vector<6x6xf32>
    %173 = vector.extract_strided_slice %164 {offsets = [192, 0], sizes = [16, 6], strides = [1, 1]} : vector<240x6xf32> to vector<16x6xf32>
    %cst_46 = arith.constant dense<0.000000e+00> : vector<6x6xf32>
    %174 = tpu.matmul %159, %173, %cst_46 {dimension_numbers = #tpu.dot_dimension_numbers<[1], [0], [0], [1], [0, 0, 1, 1], [], []>} : vector<6x16xf32>, vector<16x6xf32>, vector<6x6xf32> -> vector<6x6xf32>
    %175 = arith.mulf %166, %168 : vector<6x6xf32>
    %176 = arith.mulf %166, %166 : vector<6x6xf32>
    %177 = arith.mulf %168, %168 : vector<6x6xf32>
    %178 = arith.subf %170, %175 : vector<6x6xf32>
    %179 = arith.subf %172, %176 : vector<6x6xf32>
    %180 = arith.subf %174, %177 : vector<6x6xf32>
    %cst_47 = arith.constant 2.000000e+00 : f32
    %181 = vector.broadcast %cst_47 : f32 to vector<6x6xf32>
    %182 = arith.mulf %181, %175 : vector<6x6xf32>
    %cst_48 = arith.constant 9.99999974E-5 : f32
    %183 = vector.broadcast %cst_48 : f32 to vector<6x6xf32>
    %184 = arith.addf %182, %183 : vector<6x6xf32>
    %cst_49 = arith.constant 2.000000e+00 : f32
    %185 = vector.broadcast %cst_49 : f32 to vector<6x6xf32>
    %186 = arith.mulf %185, %178 : vector<6x6xf32>
    %cst_50 = arith.constant 8.99999984E-4 : f32
    %187 = vector.broadcast %cst_50 : f32 to vector<6x6xf32>
    %188 = arith.addf %186, %187 : vector<6x6xf32>
    %189 = arith.mulf %184, %188 : vector<6x6xf32>
    %190 = arith.addf %176, %177 : vector<6x6xf32>
    %cst_51 = arith.constant 9.99999974E-5 : f32
    %191 = vector.broadcast %cst_51 : f32 to vector<6x6xf32>
    %192 = arith.addf %190, %191 : vector<6x6xf32>
    %193 = arith.addf %179, %180 : vector<6x6xf32>
    %cst_52 = arith.constant 8.99999984E-4 : f32
    %194 = vector.broadcast %cst_52 : f32 to vector<6x6xf32>
    %195 = arith.addf %193, %194 : vector<6x6xf32>
    %196 = arith.mulf %192, %195 : vector<6x6xf32>
    %197 = arith.divf %189, %196 : vector<6x6xf32>
    %198 = vector.shape_cast %197 : vector<6x6xf32> to vector<1x6x6xf32>
    %cst_53 = arith.constant dense<0.000000e+00> : vector<1xf32>
    %199 = vector.multi_reduction <add>, %198, %cst_53 [1, 2] : vector<1x6x6xf32> to vector<1xf32>
    %200 = vector.shape_cast %199 : vector<1xf32> to vector<1x1x1xf32>
    %201 = vector.extract %200[0, 0, 0] : f32 from vector<1x1x1xf32>
    %cst_54 = arith.constant 0.000000e+00 : f32
    %202 = arith.addf %cst_54, %201 : f32
    %203 = vector.extract_strided_slice %164 {offsets = [16, 0], sizes = [16, 6], strides = [1, 1]} : vector<240x6xf32> to vector<16x6xf32>
    %cst_55 = arith.constant dense<0.000000e+00> : vector<6x6xf32>
    %204 = tpu.matmul %159, %203, %cst_55 {dimension_numbers = #tpu.dot_dimension_numbers<[1], [0], [0], [1], [0, 0, 1, 1], [], []>} : vector<6x16xf32>, vector<16x6xf32>, vector<6x6xf32> -> vector<6x6xf32>
    %205 = vector.extract_strided_slice %164 {offsets = [64, 0], sizes = [16, 6], strides = [1, 1]} : vector<240x6xf32> to vector<16x6xf32>
    %cst_56 = arith.constant dense<0.000000e+00> : vector<6x6xf32>
    %206 = tpu.matmul %159, %205, %cst_56 {dimension_numbers = #tpu.dot_dimension_numbers<[1], [0], [0], [1], [0, 0, 1, 1], [], []>} : vector<6x16xf32>, vector<16x6xf32>, vector<6x6xf32> -> vector<6x6xf32>
    %207 = vector.extract_strided_slice %164 {offsets = [112, 0], sizes = [16, 6], strides = [1, 1]} : vector<240x6xf32> to vector<16x6xf32>
    %cst_57 = arith.constant dense<0.000000e+00> : vector<6x6xf32>
    %208 = tpu.matmul %159, %207, %cst_57 {dimension_numbers = #tpu.dot_dimension_numbers<[1], [0], [0], [1], [0, 0, 1, 1], [], []>} : vector<6x16xf32>, vector<16x6xf32>, vector<6x6xf32> -> vector<6x6xf32>
    %209 = vector.extract_strided_slice %164 {offsets = [160, 0], sizes = [16, 6], strides = [1, 1]} : vector<240x6xf32> to vector<16x6xf32>
    %cst_58 = arith.constant dense<0.000000e+00> : vector<6x6xf32>
    %210 = tpu.matmul %159, %209, %cst_58 {dimension_numbers = #tpu.dot_dimension_numbers<[1], [0], [0], [1], [0, 0, 1, 1], [], []>} : vector<6x16xf32>, vector<16x6xf32>, vector<6x6xf32> -> vector<6x6xf32>
    %211 = vector.extract_strided_slice %164 {offsets = [208, 0], sizes = [16, 6], strides = [1, 1]} : vector<240x6xf32> to vector<16x6xf32>
    %cst_59 = arith.constant dense<0.000000e+00> : vector<6x6xf32>
    %212 = tpu.matmul %159, %211, %cst_59 {dimension_numbers = #tpu.dot_dimension_numbers<[1], [0], [0], [1], [0, 0, 1, 1], [], []>} : vector<6x16xf32>, vector<16x6xf32>, vector<6x6xf32> -> vector<6x6xf32>
    %213 = arith.mulf %204, %206 : vector<6x6xf32>
    %214 = arith.mulf %204, %204 : vector<6x6xf32>
    %215 = arith.mulf %206, %206 : vector<6x6xf32>
    %216 = arith.subf %208, %213 : vector<6x6xf32>
    %217 = arith.subf %210, %214 : vector<6x6xf32>
    %218 = arith.subf %212, %215 : vector<6x6xf32>
    %cst_60 = arith.constant 2.000000e+00 : f32
    %219 = vector.broadcast %cst_60 : f32 to vector<6x6xf32>
    %220 = arith.mulf %219, %213 : vector<6x6xf32>
    %cst_61 = arith.constant 9.99999974E-5 : f32
    %221 = vector.broadcast %cst_61 : f32 to vector<6x6xf32>
    %222 = arith.addf %220, %221 : vector<6x6xf32>
    %cst_62 = arith.constant 2.000000e+00 : f32
    %223 = vector.broadcast %cst_62 : f32 to vector<6x6xf32>
    %224 = arith.mulf %223, %216 : vector<6x6xf32>
    %cst_63 = arith.constant 8.99999984E-4 : f32
    %225 = vector.broadcast %cst_63 : f32 to vector<6x6xf32>
    %226 = arith.addf %224, %225 : vector<6x6xf32>
    %227 = arith.mulf %222, %226 : vector<6x6xf32>
    %228 = arith.addf %214, %215 : vector<6x6xf32>
    %cst_64 = arith.constant 9.99999974E-5 : f32
    %229 = vector.broadcast %cst_64 : f32 to vector<6x6xf32>
    %230 = arith.addf %228, %229 : vector<6x6xf32>
    %231 = arith.addf %217, %218 : vector<6x6xf32>
    %cst_65 = arith.constant 8.99999984E-4 : f32
    %232 = vector.broadcast %cst_65 : f32 to vector<6x6xf32>
    %233 = arith.addf %231, %232 : vector<6x6xf32>
    %234 = arith.mulf %230, %233 : vector<6x6xf32>
    %235 = arith.divf %227, %234 : vector<6x6xf32>
    %236 = vector.shape_cast %235 : vector<6x6xf32> to vector<1x6x6xf32>
    %cst_66 = arith.constant dense<0.000000e+00> : vector<1xf32>
    %237 = vector.multi_reduction <add>, %236, %cst_66 [1, 2] : vector<1x6x6xf32> to vector<1xf32>
    %238 = vector.shape_cast %237 : vector<1xf32> to vector<1x1x1xf32>
    %239 = vector.extract %238[0, 0, 0] : f32 from vector<1x1x1xf32>
    %240 = arith.addf %202, %239 : f32
    %241 = vector.extract_strided_slice %164 {offsets = [32, 0], sizes = [16, 6], strides = [1, 1]} : vector<240x6xf32> to vector<16x6xf32>
    %cst_67 = arith.constant dense<0.000000e+00> : vector<6x6xf32>
    %242 = tpu.matmul %159, %241, %cst_67 {dimension_numbers = #tpu.dot_dimension_numbers<[1], [0], [0], [1], [0, 0, 1, 1], [], []>} : vector<6x16xf32>, vector<16x6xf32>, vector<6x6xf32> -> vector<6x6xf32>
    %243 = vector.extract_strided_slice %164 {offsets = [80, 0], sizes = [16, 6], strides = [1, 1]} : vector<240x6xf32> to vector<16x6xf32>
    %cst_68 = arith.constant dense<0.000000e+00> : vector<6x6xf32>
    %244 = tpu.matmul %159, %243, %cst_68 {dimension_numbers = #tpu.dot_dimension_numbers<[1], [0], [0], [1], [0, 0, 1, 1], [], []>} : vector<6x16xf32>, vector<16x6xf32>, vector<6x6xf32> -> vector<6x6xf32>
    %245 = vector.extract_strided_slice %164 {offsets = [128, 0], sizes = [16, 6], strides = [1, 1]} : vector<240x6xf32> to vector<16x6xf32>
    %cst_69 = arith.constant dense<0.000000e+00> : vector<6x6xf32>
    %246 = tpu.matmul %159, %245, %cst_69 {dimension_numbers = #tpu.dot_dimension_numbers<[1], [0], [0], [1], [0, 0, 1, 1], [], []>} : vector<6x16xf32>, vector<16x6xf32>, vector<6x6xf32> -> vector<6x6xf32>
    %247 = vector.extract_strided_slice %164 {offsets = [176, 0], sizes = [16, 6], strides = [1, 1]} : vector<240x6xf32> to vector<16x6xf32>
    %cst_70 = arith.constant dense<0.000000e+00> : vector<6x6xf32>
    %248 = tpu.matmul %159, %247, %cst_70 {dimension_numbers = #tpu.dot_dimension_numbers<[1], [0], [0], [1], [0, 0, 1, 1], [], []>} : vector<6x16xf32>, vector<16x6xf32>, vector<6x6xf32> -> vector<6x6xf32>
    %249 = vector.extract_strided_slice %164 {offsets = [224, 0], sizes = [16, 6], strides = [1, 1]} : vector<240x6xf32> to vector<16x6xf32>
    %cst_71 = arith.constant dense<0.000000e+00> : vector<6x6xf32>
    %250 = tpu.matmul %159, %249, %cst_71 {dimension_numbers = #tpu.dot_dimension_numbers<[1], [0], [0], [1], [0, 0, 1, 1], [], []>} : vector<6x16xf32>, vector<16x6xf32>, vector<6x6xf32> -> vector<6x6xf32>
    %251 = arith.mulf %242, %244 : vector<6x6xf32>
    %252 = arith.mulf %242, %242 : vector<6x6xf32>
    %253 = arith.mulf %244, %244 : vector<6x6xf32>
    %254 = arith.subf %246, %251 : vector<6x6xf32>
    %255 = arith.subf %248, %252 : vector<6x6xf32>
    %256 = arith.subf %250, %253 : vector<6x6xf32>
    %cst_72 = arith.constant 2.000000e+00 : f32
    %257 = vector.broadcast %cst_72 : f32 to vector<6x6xf32>
    %258 = arith.mulf %257, %251 : vector<6x6xf32>
    %cst_73 = arith.constant 9.99999974E-5 : f32
    %259 = vector.broadcast %cst_73 : f32 to vector<6x6xf32>
    %260 = arith.addf %258, %259 : vector<6x6xf32>
    %cst_74 = arith.constant 2.000000e+00 : f32
    %261 = vector.broadcast %cst_74 : f32 to vector<6x6xf32>
    %262 = arith.mulf %261, %254 : vector<6x6xf32>
    %cst_75 = arith.constant 8.99999984E-4 : f32
    %263 = vector.broadcast %cst_75 : f32 to vector<6x6xf32>
    %264 = arith.addf %262, %263 : vector<6x6xf32>
    %265 = arith.mulf %260, %264 : vector<6x6xf32>
    %266 = arith.addf %252, %253 : vector<6x6xf32>
    %cst_76 = arith.constant 9.99999974E-5 : f32
    %267 = vector.broadcast %cst_76 : f32 to vector<6x6xf32>
    %268 = arith.addf %266, %267 : vector<6x6xf32>
    %269 = arith.addf %255, %256 : vector<6x6xf32>
    %cst_77 = arith.constant 8.99999984E-4 : f32
    %270 = vector.broadcast %cst_77 : f32 to vector<6x6xf32>
    %271 = arith.addf %269, %270 : vector<6x6xf32>
    %272 = arith.mulf %268, %271 : vector<6x6xf32>
    %273 = arith.divf %265, %272 : vector<6x6xf32>
    %274 = vector.shape_cast %273 : vector<6x6xf32> to vector<1x6x6xf32>
    %cst_78 = arith.constant dense<0.000000e+00> : vector<1xf32>
    %275 = vector.multi_reduction <add>, %274, %cst_78 [1, 2] : vector<1x6x6xf32> to vector<1xf32>
    %276 = vector.shape_cast %275 : vector<1xf32> to vector<1x1x1xf32>
    %277 = vector.extract %276[0, 0, 0] : f32 from vector<1x1x1xf32>
    %278 = arith.addf %240, %277 : f32
    %279 = tpu.iota {dimensions = array<i32: 2>} : vector<1x8x128xi32>
    %c0_i32_79 = arith.constant 0 : i32
    %280 = vector.broadcast %c0_i32_79 : i32 to vector<1x8x128xi32>
    %281 = arith.cmpi eq, %279, %280 : vector<1x8x128xi32>
    %cst_80 = arith.constant 0.000000e+00 : f32
    %282 = vector.broadcast %7 : f32 to vector<1x8x128xf32>
    %283 = vector.broadcast %cst_80 : f32 to vector<1x8x128xf32>
    %284 = arith.select %281, %282, %283 : vector<1x8x128xi1>, vector<1x8x128xf32>
    %c1_i32_81 = arith.constant 1 : i32
    %285 = vector.broadcast %c1_i32_81 : i32 to vector<1x8x128xi32>
    %286 = arith.cmpi eq, %279, %285 : vector<1x8x128xi32>
    %cst_82 = arith.constant 0.000000e+00 : f32
    %287 = vector.broadcast %21 : f32 to vector<1x8x128xf32>
    %288 = vector.broadcast %cst_82 : f32 to vector<1x8x128xf32>
    %289 = arith.select %286, %287, %288 : vector<1x8x128xi1>, vector<1x8x128xf32>
    %290 = arith.addf %284, %289 : vector<1x8x128xf32>
    %c2_i32_83 = arith.constant 2 : i32
    %291 = vector.broadcast %c2_i32_83 : i32 to vector<1x8x128xi32>
    %292 = arith.cmpi eq, %279, %291 : vector<1x8x128xi32>
    %cst_84 = arith.constant 0.000000e+00 : f32
    %293 = vector.broadcast %43 : f32 to vector<1x8x128xf32>
    %294 = vector.broadcast %cst_84 : f32 to vector<1x8x128xf32>
    %295 = arith.select %292, %293, %294 : vector<1x8x128xi1>, vector<1x8x128xf32>
    %296 = arith.addf %290, %295 : vector<1x8x128xf32>
    %c3_i32_85 = arith.constant 3 : i32
    %297 = vector.broadcast %c3_i32_85 : i32 to vector<1x8x128xi32>
    %298 = arith.cmpi eq, %279, %297 : vector<1x8x128xi32>
    %cst_86 = arith.constant 0.000000e+00 : f32
    %299 = vector.broadcast %278 : f32 to vector<1x8x128xf32>
    %300 = vector.broadcast %cst_86 : f32 to vector<1x8x128xf32>
    %301 = arith.select %298, %299, %300 : vector<1x8x128xi1>, vector<1x8x128xf32>
    %302 = arith.addf %296, %301 : vector<1x8x128xf32>
    %c0_87 = arith.constant 0 : index
    %c0_88 = arith.constant 0 : index
    %c0_89 = arith.constant 0 : index
    %303 = vector.load %arg3[%c0_87, %c0_88, %c0_89] : memref<1x8x128xf32, #tpu.memory_space<vmem>>, vector<1x8x128xf32>
    tpu.vector_store %arg3[%c0_87, %c0_88, %c0_89], %302 {strides = array<i32>} : memref<1x8x128xf32, #tpu.memory_space<vmem>>, vector<1x8x128xf32>,
    return
  }
  func.func @transform_0(%arg0: i32) -> (i32, i32) {
    %c0_i32 = arith.constant 0 : i32
    %c0_i32_0 = arith.constant 0 : i32
    return %arg0, %c0_i32 : i32, i32
  }
  func.func @transform_1(%arg0: i32) -> (i32, i32) {
    %c0_i32 = arith.constant 0 : i32
    %c0_i32_0 = arith.constant 0 : i32
    return %arg0, %c0_i32 : i32, i32
  }
  func.func @transform_2(%arg0: i32) -> (i32, i32, i32) {
    %c0_i32 = arith.constant 0 : i32
    %c0_i32_0 = arith.constant 0 : i32
    %c0_i32_1 = arith.constant 0 : i32
    return %arg0, %c0_i32, %c0_i32_0 : i32, i32, i32
  }
}

</mosaic_0001>

<bundles_post_ra>
// kernel: tpu_custom_call.1
= control target key start
LH: loop header
LB: loop body
LE: loop exit
PB: predicated region body
PF: predicated region fallthrough
CT: control target
= control target key end

     0   :  { %7 = vsyncpa [#allocation3], 0  ;;  %s1834_s0 = inlined_call_operand.vmem [shape: f32[96,16], index: 0, kind: input, shape index: {}]   ;;  %s1835_s1 = inlined_call_operand.vmem [shape: f32[96,16], index: 1, kind: input, shape index: {}]   ;;  %s1836_s2 = inlined_call_operand.hbm [shape: f32[2,8,128], index: 2, kind: output, shape index: {}]  }
   0x1   :  { %9 = vsyncpa [#allocation3 + $0x1], 0  ;;  %s1448_s9 = smov 0   ;;  %s1450_s10 = smov 0  }
   0x2   :  { %s1452_s11 = smov 0   ;;  %s1454_s12 = smov 0  }
   0x3 LB: > { %s1469_s13 = sadd.s32 4294967295, %s1429_s12   ;;  %s1246_s14 = sadd.s32 4294967294, %s1429_s12   ;;  %s1429_s12 = sphi %s1454_s12, %s1842_s12   ;;  %s1425_s11 = sphi %s1452_s11, %s1841_s11   ;;  %s1421_s10 = sphi %s1450_s10, %s1840_s10   ;;  %s1417_s9 = sphi %s1448_s9, %s1839_s9  }
   0x4   : > { %s1473_s15 = sadd.s32 1, %s1429_s12   ;;  %s74_s16 = sadd.s32 1, %s1425_s11 }
   0x5   : > { %s71_s17 = ssub.s32 %s1429_s12, %s1473_s15  ;;  %p84_p0 = scmp.ne.s32.totalorder %s1425_s11, %s1421_s10 }
   0x6   : > { %p72_p1 = scmp.eq.s32.totalorder %s71_s17, 0  ;;  %p85_p2 = scmp.eq.s32.totalorder %s1469_s13, 1 }
   0x7   : > { %p90_p3 = scmp.ne.s32.totalorder %s1421_s10, %s1417_s9  ;;  %p91_p4 = scmp.eq.s32.totalorder %s1246_s14, 1 }
   0x8   : > { %s1484_s18 = scalar_select %p72_p1, %s1425_s11, %s74_s16  }
   0x9   : > { %p1486_p5 = por %p85_p2, %p84_p0  ;;  %p1490_p6 = por %p91_p4, %p90_p3 }
   0xa   : > { %p1249_p7 = scmp.ge.s32.totalorder %s1429_s12, 1  ;;  %p127_p8 = scmp.lt.s32.totalorder %s1429_s12, 3 }
   0xc   : > { %p128_p9 = pnand %p1249_p7, %p127_p8 }
   0xd   : > { %s154_s21 = smul.u32 (!%p128_p9), 6, %s1469_s13  ;;  %s1432_s29 = smov (!%p128_p9), 127  }
   0xe   : > { %131 = sbr.rel (%p128_p9) target bundleno = 614 (0x266), region = 28  ;;  %s151_s4 = sand.u32 (!%p128_p9), 1, %s1421_s10  }
   0xf   : > { %p155_p10 = scmp.lt.s32.totalorder (!%p128_p9), %s154_s21, 11  ;;  %s1250_s7 = sshll.u32 (!%p128_p9), %s151_s4, 3 }
  0x10   : > { %s1299_s14 = sshll.u32 (!%p128_p9), %s1469_s13, 3  ;;  %s1160_s13 = scalar_lea.sflag (!%p128_p9), [#allocation3], %s151_s4 }
  0x13   : > { %v387_v0 = vlaneseq  ;;  %v1431_v5 = vmov 0.0   ;;  %s1844_s21 = smov (!%p155_p10, %s154_s21), 11 }
  0x14   : > { %s1251_s22 = sshll.u32 %s1844_s21, 3 }
  0x15   : > { %v1496_v1 = vshrl.u32 %v387_v0, 7  ;;  %v1498_v2 = vand.u32 127, %v387_v0  ;;  %s1513_s25 = scalar_lea.vmem %s1834_s0, %s1251_s22  ;;  %s1518_s28 = scalar_lea.vmem %s1835_s1, %s1251_s22 }
  0x16   : > { %v1521_v22 = vld [vmem:[%s1518_s28 + $0x8] sm:$0xff]  ;;  %v1524_v24 = vld [vmem:[%s1513_s25] sm:$0xff]  ;;  %v1537_v31 = vld [vmem:[%s1518_s28 + $0x10] sm:$0xff]  ;;  %s1170_s22 = scalar_lea.hbm %s1836_s2, %s1299_s14 }
  0x17   : > { %v1502_v3 = vadd.s32 8, %v1496_v1  ;;  %v441_v8 = vsub.s32 %v1496_v1, %v1498_v2  ;;  %v517_v26 = vmul.f32 %v1521_v22, %v1521_v22  ;;  %v1529_v28 = vld [vmem:[%s1518_s28] sm:$0xff]  ;;  %v1541_v32 = vld [vmem:[%s1513_s25 + $0x8] sm:$0xff]  ;;  %v518_v33 = vmul.f32 %v1537_v31, %v1537_v31  ;;  %v1551_v35 = vld [vmem:[%s1518_s28 + $0x18] sm:$0xff]  ;;  %217 = vrot.lane.b32.xlu0 %v1524_v24, %s1432_s29  ;;  %s1174_s27 = sshll.u32 %s1170_s22, 4  ;;  %s1175_s27 = int_to_ptr.hbm [resolvable:$true] %s1174_s27 }
  0x18   : > { %v510_v30 = vmul.f32 %v1529_v28, %v1524_v24  ;;  %v511_v34 = vmul.f32 %v1521_v22, %v1541_v32  ;;  %v1555_v36 = vld [vmem:[%s1513_s25 + $0x10] sm:$0xff]  ;;  %v519_v37 = vmul.f32 %v1551_v35, %v1551_v35  ;;  %v1565_v39 = vld [vmem:[%s1518_s28 + $0x20] sm:$0xff]  ;;  %v1569_v40 = vld [vmem:[%s1513_s25 + $0x18] sm:$0xff]  ;;  %v522_v50 = vmul.f32 %v1524_v24, %v1524_v24  ;;  %253 = vrot.lane.b32.xlu1 %v1529_v28, %s1432_s29 }
  0x19   : > { %v442_v4 = vsub.s32 %v1502_v3, %v1498_v2  ;;  %vm443_vm9 = vcmp.eq.s32.totalorder %v441_v8, 0  ;;  %vm447_vm10 = vcmp.eq.s32.totalorder %v441_v8, 1  ;;  %vm451_vm13 = vcmp.eq.s32.totalorder %v441_v8, 2  ;;  %v1579_v43 = vld [vmem:[%s1518_s28 + $0x28] sm:$0xff]  ;;  %v1583_v44 = vld [vmem:[%s1513_s25 + $0x20] sm:$0xff]  ;;  %221 = vrot.lane.b32.xlu2 %v1555_v36, %s1432_s29  ;;  %s1381_s28 = sshra.s32 %s1175_s27, 4  ;;  %s1382_s28 = int_to_ptr.hbm [resolvable:$true] %s1381_s28 }
  0x1a   : > { %v445_v14 = vsel %vm443_vm9, 0.0010283801, %v1431_v5  ;;  %vm455_vm14 = vcmp.eq.s32.totalorder %v441_v8, 3  ;;  %vm459_vm15 = vcmp.eq.s32.totalorder %v441_v8, 4  ;;  %v512_v38 = vmul.f32 %v1537_v31, %v1555_v36  ;;  %v1597_v48 = vld [vmem:[%s1513_s25 + $0x28] sm:$0xff]  ;;  %s153_s25 = scalar_lea.vmem [#allocation2], %s1250_s7  ;;  %p1388_p0 = scmp.lt.s32.totalorder %s1382_s28, %s1836_s2 }
  0x1b   : > { %vm444_vm0 = vcmp.eq.s32.totalorder %v442_v4, 0  ;;  %vm448_vm1 = vcmp.eq.s32.totalorder %v442_v4, 1  ;;  %vm452_vm2 = vcmp.eq.s32.totalorder %v442_v4, 2  ;;  %vm456_vm3 = vcmp.eq.s32.totalorder %v442_v4, 3  ;;  %s1172_s26 = sshll.u32 %s153_s25, 4  ;;  %s1173_s26 = int_to_ptr.vmem [resolvable:$true] %s1172_s26 }
  0x1c   : > { %v446_v6 = vsel %vm444_vm0, 0.0010283801, %v1431_v5  ;;  %vm460_vm4 = vcmp.eq.s32.totalorder %v442_v4, 4  ;;  %vm464_vm5 = vcmp.eq.s32.totalorder %v442_v4, 5  ;;  %vm468_vm6 = vcmp.eq.s32.totalorder %v442_v4, 6 }
  0x1d   : > { %v450_v7 = vsel %vm448_vm1, 0.007598758, %v446_v6  ;;  %vm472_vm7 = vcmp.eq.s32.totalorder %v442_v4, 7  ;;  %vm476_vm8 = vcmp.eq.s32.totalorder %v442_v4, 8  ;;  %vm480_vm11 = vcmp.eq.s32.totalorder %v442_v4, 9 }
  0x1e   : > { %v454_v9 = vsel %vm452_vm2, 0.036000773, %v450_v7  ;;  %vm484_vm12 = vcmp.eq.s32.totalorder %v442_v4, 10  ;;  %v449_v16 = vsel %vm447_vm10, 0.007598758, %v445_v14  ;;  %vm463_vm0 = vcmp.eq.s32.totalorder %v441_v8, 5 }
  0x1f   : > { %v458_v10 = vsel %vm456_vm3, 0.10936069, %v454_v9  ;;  %v453_v19 = vsel %vm451_vm13, 0.036000773, %v449_v16  ;;  %vm467_vm1 = vcmp.eq.s32.totalorder %v441_v8, 6  ;;  %vm471_vm2 = vcmp.eq.s32.totalorder %v441_v8, 7  ;;  %219 = vrot.lane.b32.xlu0 %v1541_v32, %s1432_s29 }
  0x20   : > { %v462_v11 = vsel %vm460_vm4, 0.21300554, %v458_v10  ;;  %v457_v21 = vsel %vm455_vm14, 0.10936069, %v453_v19  ;;  %vm190_vm3 = vcmask 130048   ;;  %v520_v41 = vmul.f32 %v1565_v39, %v1565_v39  ;;  %255 = vrot.lane.b32.xlu1 %v1521_v22, %s1432_s29 }
  0x21   : > { %v466_v12 = vsel %vm464_vm5, 0.26601171, %v462_v11  ;;  %v461_v23 = vsel %vm459_vm15, 0.21300554, %v457_v21  ;;  %v513_v42 = vmul.f32 %v1551_v35, %v1569_v40  ;;  %v524_v45 = vmul.f32 %v1555_v36, %v1555_v36  ;;  %257 = vrot.lane.b32.xlu2 %v1537_v31, %s1432_s29 }
  0x22   : > { %v470_v13 = vsel %vm468_vm6, 0.21300554, %v466_v12  ;;  %v465_v25 = vsel %vm463_vm0, 0.26601171, %v461_v23  ;;  %v521_v46 = vmul.f32 %v1579_v43, %v1579_v43  ;;  %v514_v47 = vmul.f32 %v1565_v39, %v1583_v44 }
  0x23   : > { %v474_v15 = vsel %vm472_vm7, 0.10936069, %v470_v13  ;;  %v469_v27 = vsel %vm467_vm1, 0.21300554, %v465_v25  ;;  %v525_v49 = vmul.f32 %v1569_v40, %v1569_v40  ;;  %v515_v51 = vmul.f32 %v1579_v43, %v1597_v48 }
  0x24   : > { %v478_v17 = vsel %vm476_vm8, 0.036000773, %v474_v15  ;;  %v473_v29 = vsel %vm471_vm2, 0.10936069, %v469_v27  ;;  %v526_v52 = vmul.f32 %v1583_v44, %v1583_v44  ;;  %v523_v53 = vmul.f32 %v1541_v32, %v1541_v32 }
  0x25   : > { %v482_v18 = vsel %vm480_vm11, 0.007598758, %v478_v17  ;;  %v516_v54 = vmul.f32 %v1529_v28, %v1529_v28  ;;  %v527_v55 = vmul.f32 %v1597_v48, %v1597_v48  ;;  %v487_v56 = vsub.s32 %v1498_v2, %v1496_v1 }
  0x26   : > { %v486_v20 = vsel %vm484_vm12, 0.0010283801, %v482_v18  ;;  %vm316_vm15 = vcmask 1046528   ;;  %vm295_vm0 = vcmask 121856   ;;  %vm395_vm1 = vcmp.eq.s32.totalorder %v1502_v3, 15 }
  0x27   : > { %620 = vmatpush.msra.mxu0 %v486_v20  ;;  %1303 = vmatpush.msra.mxu2 %v486_v20  ;;  %vm488_vm4 = vcmp.eq.s32.totalorder %v487_v56, 0  ;;  %vm490_vm5 = vcmp.eq.s32.totalorder %v487_v56, 1  ;;  %vm492_vm6 = vcmp.eq.s32.totalorder %v487_v56, 2  ;;  %vm494_vm7 = vcmp.eq.s32.totalorder %v487_v56, 3 }
  0x28   : > { %1302 = vmatpush.msra.mxu1 %v486_v20  ;;  %1304 = vmatpush.msra.mxu3 %v486_v20  ;;  %v489_v57 = vsel %vm488_vm4, 0.0010283801, %v1431_v5  ;;  %vm496_vm8 = vcmp.eq.s32.totalorder %v487_v56, 4  ;;  %vm498_vm9 = vcmp.eq.s32.totalorder %v487_v56, 5  ;;  %vm500_vm10 = vcmp.eq.s32.totalorder %v487_v56, 6 }
  0x29   : > { %621 = vmatpush.msra.mxu0 %v473_v29  ;;  %1306 = vmatpush.msra.mxu2 %v473_v29  ;;  %v491_v58 = vsel %vm490_vm5, 0.007598758, %v489_v57  ;;  %vm502_vm11 = vcmp.eq.s32.totalorder %v487_v56, 7  ;;  %vm504_vm12 = vcmp.eq.s32.totalorder %v487_v56, 8  ;;  %vm506_vm13 = vcmp.eq.s32.totalorder %v487_v56, 9 }
  0x2a   : > { %1253 = vmatmul.msk.f32.vlgmr.msra.gmra.mxu0 %vm190_vm3, %v1529_v28  ;;  %1272 = vmatmul.msk.f32.vlgmr.msra.gmra.mxu2 %vm190_vm3, %v517_v26  ;;  %v493_v59 = vsel %vm492_vm6, 0.036000773, %v491_v58  ;;  %vm508_vm14 = vcmp.eq.s32.totalorder %v487_v56, 10  ;;  %v346_v57 = vrot.slane %v1529_v28, 1  ;;  %v347_v58 = vrot.slane %v1521_v22, 1 }
  0x2b   : > { %1305 = vmatpush.msra.mxu1 %v473_v29  ;;  %1307 = vmatpush.msra.mxu3 %v473_v29  ;;  %v495_v60 = vsel %vm494_vm7, 0.10936069, %v493_v59  ;;  %vm427_vm4 = vcmask 129024  }
  0x2c   : > { %1265 = vmatmul.msk.f32.vlgmr.msra.gmra.mxu1 %vm190_vm3, %v510_v30  ;;  %1279 = vmatmul.msk.f32.vlgmr.msra.gmra.mxu3 %vm190_vm3, %v524_v45  ;;  %v497_v61 = vsel %vm496_vm8, 0.21300554, %v495_v60  ;;  %vm847_vm8 = vcmask 46080  }
  0x2d   : > { %223 = vrot.lane.b32.xlu0 %v1569_v40, %s1432_s29  ;;  %259 = vrot.lane.b32.xlu1 %v1551_v35, %s1432_s29  ;;  %v499_v62 = vsel %vm498_vm9, 0.26601171, %v497_v61  ;;  %v322_v61 = vrot.slane %v1569_v40, 1 }
  0x2e   : > { %225 = vrot.lane.b32.xlu2 %v1583_v44, %s1432_s29  ;;  %v501_v63 = vsel %vm500_vm10, 0.21300554, %v499_v62  ;;  %v349_v62 = vrot.slane %v1537_v31, 1 }
  0x2f   : > { %v503_v4 = vsel %vm502_vm11, 0.10936069, %v501_v63 }
  0x30   : > { %v505_v7 = vsel %vm504_vm12, 0.036000773, %v503_v4 }
  0x31   : > { %v507_v8 = vsel %vm506_vm13, 0.007598758, %v505_v7  ;;  %v348_v7 = vsel %vm316_vm15, %v346_v57, %v347_v58 }
  0x32   : > { %1254 = vmatmul.msk.f32.gmra.mxu0 %vm190_vm3, %v1521_v22  ;;  %1273 = vmatmul.msk.f32.gmra.mxu2 %vm190_vm3, %v518_v33  ;;  %v1649_v11 = vsel %vm508_vm14, 0.0010283801, %v507_v8 }
  0x34   : > { %1266 = vmatmul.msk.f32.gmra.mxu1 %vm190_vm3, %v511_v34  ;;  %1280 = vmatmul.msk.f32.gmra.mxu3 %vm190_vm3, %v525_v49 }
  0x35   : > { %261 = vrot.lane.b32.xlu0 %v1565_v39, %s1432_s29  ;;  %227 = vrot.lane.b32.xlu1 %v1597_v48, %s1432_s29 }
  0x36   : > { %263 = vrot.lane.b32.xlu2 %v1579_v43, %s1432_s29  ;;  %s1383_s29 = scalar_lea.hbm %s1382_s28, 8 }
  0x37   : > { %p1384_p11 = scmp.ne.s32.totalorder %s1382_s28, %s1383_s29 }
  0x39   : > { %p1385_p12 = pnand %p1384_p11, %p1486_p5 }
  0x3a   : > { %1255 = vmatmul.msk.f32.gmra.mxu0 %vm190_vm3, %v1537_v31  ;;  %1274 = vmatmul.msk.f32.gmra.mxu2 %vm190_vm3, %v519_v37 }
  0x3b   : > { %p1386_p13 = pneg %p1385_p12 }
  0x3c   : > { %1267 = vmatmul.msk.f32.gmra.mxu1 %vm190_vm3, %v512_v38  ;;  %1281 = vmatmul.msk.f32.gmra.mxu3 %vm190_vm3, %v526_v52  ;;  %v318_v52 = vrot.slane %v1541_v32, 1 }
  0x42   : > { %1256 = vmatmul.msk.f32.gmra.mxu0 %vm190_vm3, %v1551_v35  ;;  %1275 = vmatmul.msk.f32.gmra.mxu2 %vm190_vm3, %v520_v41 }
  0x44   : > { %1268 = vmatmul.msk.f32.gmra.mxu1 %vm190_vm3, %v513_v42  ;;  %1282 = vmatmul.msk.f32.gmra.mxu3 %vm190_vm3, %v527_v55  ;;  %v317_v55 = vrot.slane %v1524_v24, 1 }
  0x46   : > { %v319_v63 = vsel %vm316_vm15, %v317_v55, %v318_v52 }
  0x4a   : > { %1257 = vmatmul.msk.f32.gmra.mxu0 %vm190_vm3, %v1565_v39  ;;  %1276 = vmatmul.msk.f32.gmra.mxu2 %vm190_vm3, %v521_v46 }
  0x4c   : > { %1269 = vmatmul.msk.f32.gmra.mxu1 %vm190_vm3, %v514_v47 }
  0x52   : > { %1258 = vmatmul.msk.f32.gmra.mxu0 %vm190_vm3, %v1579_v43  ;;  %1277 = vmatmul.msk.f32.gmra.mxu2 %vm190_vm3, %v522_v50 }
  0x54   : > { %1270 = vmatmul.msk.f32.gmra.mxu1 %vm190_vm3, %v515_v51 }
  0x5a   : > { %1259 = vmatmul.msk.f32.gmra.mxu0 %vm190_vm3, %v1524_v24  ;;  %1278 = vmatmul.msk.f32.gmra.mxu2 %vm190_vm3, %v523_v53  ;;  %v320_v53 = vrot.slane %v1555_v36, 1 }
  0x5c   : > { %1271 = vmatmul.msk.f32.gmra.mxu1 %vm190_vm3, %v516_v54  ;;  %v321_v56 = vsel %vm316_vm15, %v318_v52, %v320_v53 }
  0x5d   : > { %v335_v4 = vsub.f32 %v1541_v32, %v321_v56 }
  0x62   : > { %1260 = vmatmul.msk.f32.gmra.mxu0 %vm190_vm3, %v1541_v32 }
  0x6a   : > { %1261 = vmatmul.msk.f32.gmra.mxu0 %vm190_vm3, %v1555_v36 }
  0x72   : > { %1262 = vmatmul.msk.f32.gmra.mxu0 %vm190_vm3, %v1569_v40 }
  0x73   : > { %v222_v51 = vpop.permute.xlu2 %221 }
  0x7a   : > { %1263 = vmatmul.msk.f32.gmra.mxu0 %vm190_vm3, %v1583_v44 }
  0x7b   : > { %v258_v60 = vpop.permute.xlu2 %257 }
  0x7c   : > { %v273_v55 = vsub.f32 %v1537_v31, %v258_v60 }
  0x82   : > { %1264 = vmatmul.msk.f32.gmra.mxu0 %vm190_vm3, %v1597_v48 }
  0x89   : > { %v218_v49 = vpop.permute.xlu0 %217 }
  0x8a   : > { %v254_v50 = vpop.permute.xlu1 %253 }
  0x91   : > { %v220_v54 = vpop.permute.xlu0 %219 }
  0x92   : > { %v256_v59 = vpop.permute.xlu1 %255 }
  0xa7   : > { %v623_v0 = vpop.f32.mrf.mxu0 }
  0xa9   : > { %v659_v6 = vpop.f32.mrf.mxu1 }
  0xad   : > { %v680_v5 = vpop.f32.mrf.mxu2 }
  0xaf   : > { %v626_v9 = vpop.f32.mrf.mxu0  ;;  %v701_v34 = vpop.f32.mrf.mxu3 }
  0xb0   : > { %730 = vmatpush.msrb.mxu1 %v626_v9  ;;  %v334_v9 = vsub.f32 %v1524_v24, %v319_v63 }
  0xb1   : > { %v662_v10 = vpop.f32.mrf.mxu1 }
  0xb2   : > { %731 = vmatpush.msrb.mxu1 %v623_v0  ;;  %770 = vmatpush.msrb.mxu3 %v662_v10  ;;  %v324_v0 = vrot.slane %v1583_v44, 1  ;;  %v350_v10 = vsel %vm316_vm15, %v347_v58, %v349_v62 }
  0xb3   : > { %1283 = vmatmul.msk.f32.vlgmr.msrb.gmra.mxu1 %vm190_vm3, %v1649_v11 }
  0xb4   : > { %790 = vmatpush.msra.mxu1 %v680_v5  ;;  %771 = vmatpush.msrb.mxu3 %v659_v6  ;;  %v323_v6 = vsel %vm316_vm15, %v320_v53, %v322_v61  ;;  %v351_v5 = vrot.slane %v1551_v35, 1 }
  0xb5   : > { %v683_v12 = vpop.f32.mrf.mxu2  ;;  %1285 = vmatmul.msk.f32.vlgmr.msrb.gmra.mxu3 %vm190_vm3, %v1649_v11 }
  0xb7   : > { %v629_v13 = vpop.f32.mrf.mxu0  ;;  %v704_v38 = vpop.f32.mrf.mxu3 }
  0xb9   : > { %v665_v14 = vpop.f32.mrf.mxu1 }
  0xbd   : > { %v686_v15 = vpop.f32.mrf.mxu2 }
  0xbf   : > { %v632_v16 = vpop.f32.mrf.mxu0  ;;  %v707_v45 = vpop.f32.mrf.mxu3 }
  0xc0   : > { %873 = vmatpush.msra.mxu3 %v632_v16  ;;  %v336_v16 = vsub.f32 %v1555_v36, %v323_v6 }
  0xc1   : > { %v668_v17 = vpop.f32.mrf.mxu1 }
  0xc2   : > { %874 = vmatpush.msra.mxu3 %v629_v13  ;;  %v325_v13 = vsel %vm316_vm15, %v322_v61, %v324_v0  ;;  %v279_v61 = vand.u32 2147483647, %v273_v55 }
  0xc3   : > { %1288 = vmatmul.msk.f32.vlgmr.msra.gmra.mxu3 %vm190_vm3, %v1649_v11 }
  0xc4   : > { %933 = vmatpush.msrb.mxu3 %v686_v15  ;;  %v224_v15 = vpop.permute.xlu0 %223 }
  0xc5   : > { %v689_v18 = vpop.f32.mrf.mxu2 }
  0xc6   : > { %934 = vmatpush.msrb.mxu3 %v683_v12 }
  0xc7   : > { %v635_v19 = vpop.f32.mrf.mxu0  ;;  %v710_v47 = vpop.f32.mrf.mxu3 }
  0xc9   : > { %v671_v20 = vpop.f32.mrf.mxu1 }
  0xcb   : > { %1291 = vmatmul.msk.f32.vlgmr.msrb.gmra.mxu3 %vm190_vm3, %v1649_v11 }
  0xcd   : > { %v692_v21 = vpop.f32.mrf.mxu2 }
  0xcf   : > { %v638_v23 = vpop.f32.mrf.mxu0 }
  0xd1   : > { %v674_v25 = vpop.f32.mrf.mxu1 }
  0xd5   : > { %v695_v27 = vpop.f32.mrf.mxu2 }
  0xd7   : > { %v641_v26 = vpop.f32.mrf.mxu0 }
  0xd9   : > { %v677_v29 = vpop.f32.mrf.mxu1 }
  0xda   : > { %791 = vmatpush.msra.mxu1 %v677_v29  ;;  %v337_v29 = vsub.f32 %v1569_v40, %v325_v13 }
  0xdb   : > { %1286 = vmatmul.msk.f32.vlgmr.msra.gmra.mxu1 %vm190_vm3, %v1649_v11 }
  0xdc   : > { %v343_v63 = vand.u32 2147483647, %v337_v29 }
  0xdd   : > { %v698_v33 = vpop.f32.mrf.mxu2 }
  0xdf   : > { %v644_v30 = vpop.f32.mrf.mxu0 }
  0xe0   : > { %750 = vmatpush.msrb.mxu2 %v644_v30  ;;  %v1717_v30 = vand.u32 2147483647, %v334_v9 }
  0xe2   : > { %751 = vmatpush.msrb.mxu2 %v641_v26  ;;  %v237_v26 = vsub.f32 %v1555_v36, %v222_v51 }
  0xe3   : > { %1284 = vmatmul.msk.f32.vlgmr.msrb.gmra.mxu2 %vm190_vm3, %v1649_v11 }
  0xe4   : > { %810 = vmatpush.msra.mxu2 %v698_v33  ;;  %v243_v52 = vand.u32 2147483647, %v237_v26 }
  0xe6   : > { %811 = vmatpush.msra.mxu2 %v695_v27  ;;  %v260_v27 = vpop.permute.xlu1 %259  ;;  %v285_v60 = vsub.f32 %v279_v61, %v243_v52 }
  0xe7   : > { %v647_v37 = vpop.f32.mrf.mxu0 }
  0xe8   : > { %913 = vmatpush.msrb.mxu2 %v668_v17  ;;  %v1707_v17 = vand.u32 2147483647, %v335_v4  ;;  %v262_v4 = vpop.permute.xlu0 %261  ;;  %v291_v29 = vand.u32 2147483647, %v285_v60 }
  0xe9   : > { %v275_v26 = vsub.f32 %v1565_v39, %v262_v4  ;;  %v391_v4 = vadd.s32 24, %v1496_v1 }
  0xea   : > { %914 = vmatpush.msrb.mxu2 %v665_v14  ;;  %v326_v14 = vrot.slane %v1597_v48, 1 }
  0xeb   : > { %1287 = vmatmul.msk.f32.vlgmr.msra.gmra.mxu2 %vm190_vm3, %v1649_v11  ;;  %v281_v52 = vand.u32 2147483647, %v275_v26  ;;  %vm403_vm2 = vcmp.eq.s32.totalorder %v391_v4, 31  ;;  %v178_v26 = vsub.f32 %v1529_v28, %v1524_v24 }
  0xec   : > { %1015 = vmatpush.msra.mxu2 %v638_v23  ;;  %v352_v23 = vsel %vm316_vm15, %v349_v62, %v351_v5  ;;  %v238_v62 = vsub.f32 %v1569_v40, %v224_v15  ;;  %v339_v9 = vsub.f32 %v1597_v48, %v326_v14 }
  0xee   : > { %1016 = vmatpush.msra.mxu2 %v635_v19  ;;  %v363_v19 = vsub.f32 %v1529_v28, %v348_v7  ;;  %v228_v13 = vpop.permute.xlu1 %227 }
  0xef   : > { %v650_v41 = vpop.f32.mrf.mxu0 }
  0xf0   : > { %893 = vmatpush.msrb.mxu1 %v650_v41  ;;  %v226_v41 = vpop.permute.xlu2 %225  ;;  %v369_v58 = vand.u32 2147483647, %v363_v19 }
  0xf2   : > { %894 = vmatpush.msrb.mxu1 %v647_v37 }
  0xf3   : > { %1290 = vmatmul.msk.f32.vlgmr.msrb.gmra.mxu2 %vm190_vm3, %v1649_v11  ;;  %1289 = vmatmul.msk.f32.vlgmr.msrb.gmra.mxu1 %vm190_vm3, %v1649_v11 }
  0xf4   : > { %1075 = vmatpush.msrb.mxu2 %v692_v21  ;;  %953 = vmatpush.msra.mxu1 %v704_v38  ;;  %v271_v21 = vsub.f32 %v1529_v28, %v254_v50  ;;  %v236_v38 = vsub.f32 %v1541_v32, %v220_v54  ;;  %v365_v50 = vsub.f32 %v1537_v31, %v352_v23  ;;  %v184_v28 = vand.u32 2147483647, %v178_v26 }
  0xf5   : > { %v239_v23 = vsub.f32 %v1583_v44, %v226_v41 }
  0xf6   : > { %1076 = vmatpush.msrb.mxu2 %v689_v18  ;;  %954 = vmatpush.msra.mxu1 %v701_v34  ;;  %v355_v18 = vrot.slane %v1579_v43, 1  ;;  %v277_v37 = vand.u32 2147483647, %v271_v21  ;;  %v242_v53 = vand.u32 2147483647, %v236_v38 }
  0xf7   : > { %v653_v42 = vpop.f32.mrf.mxu0 }
  0xf8   : > { %1055 = vmatpush.msrb.mxu1 %v674_v25  ;;  %v364_v25 = vsub.f32 %v1521_v22, %v350_v10  ;;  %v371_v10 = vand.u32 2147483647, %v365_v50  ;;  %v368_v19 = vsub.f32 %v1579_v43, %v355_v18 }
  0xfa   : > { %1056 = vmatpush.msrb.mxu1 %v671_v20  ;;  %v235_v20 = vsub.f32 %v1524_v24, %v218_v49  ;;  %v370_v7 = vand.u32 2147483647, %v364_v25  ;;  %v183_v24 = vsub.f32 %v1579_v43, %v1597_v48 }
  0xfb   : > { %1293 = vmatmul.msk.f32.vlgmr.msra.gmra.mxu2 %vm190_vm3, %v1649_v11  ;;  %1292 = vmatmul.msk.f32.vlgmr.msra.gmra.mxu1 %vm190_vm3, %v1649_v11 }
  0xfc   : > { %v241_v34 = vand.u32 2147483647, %v235_v20  ;;  %v244_v20 = vand.u32 2147483647, %v238_v62 }
  0xfe   : > { %v283_v51 = vsub.f32 %v277_v37, %v241_v34 }
  0xff   : > { %v656_v46 = vpop.f32.mrf.mxu0 }
 0x100   : > { %1035 = vmatpush.msra.mxu3 %v656_v46  ;;  %v272_v46 = vsub.f32 %v1521_v22, %v256_v59  ;;  %v274_v59 = vsub.f32 %v1551_v35, %v260_v27  ;;  %v264_v27 = vpop.permute.xlu2 %263 }
 0x101   : > { %v276_v41 = vsub.f32 %v1579_v43, %v264_v27  ;;  %v179_v27 = vsub.f32 %v1521_v22, %v1541_v32 }
 0x102   : > { %1036 = vmatpush.msra.mxu3 %v653_v42  ;;  %v327_v42 = vsel %vm316_vm15, %v324_v0, %v326_v14  ;;  %v278_v56 = vand.u32 2147483647, %v272_v46  ;;  %v280_v21 = vand.u32 2147483647, %v274_v59  ;;  %v376_v14 = vsub.f32 %v370_v7, %v1707_v17 }
 0x103   : > { %1294 = vmatmul.msk.f32.vlgmr.msra.gmra.mxu3 %vm190_vm3, %v1649_v11  ;;  %1296 = vmatmul.msk.f32.vlgmr.msrb.gmra.mxu2 %vm190_vm3, %v1649_v11  ;;  %v338_v54 = vsub.f32 %v1583_v44, %v327_v42  ;;  %v345_v46 = vand.u32 2147483647, %v339_v9  ;;  %v245_v17 = vand.u32 2147483647, %v239_v23  ;;  %v185_v32 = vand.u32 2147483647, %v179_v27 }
 0x104   : > { %1095 = vmatpush.msrb.mxu3 %v710_v47  ;;  %1295 = vmatmul.msk.f32.vlgmr.msrb.gmra.mxu1 %vm190_vm3, %v1649_v11  ;;  %v342_v47 = vand.u32 2147483647, %v336_v16  ;;  %v284_v0 = vsub.f32 %v278_v56, %v242_v53 }
 0x105   : > { %v344_v16 = vand.u32 2147483647, %v338_v54 }
 0x106   : > { %1096 = vmatpush.msrb.mxu3 %v707_v45  ;;  %v377_v38 = vsub.f32 %v371_v10, %v342_v47  ;;  %v299_v47 = vsel %vm295_vm0, %v291_v29, 0.0 }
 0x108   : > { %v383_v62 = vand.u32 2147483647, %v377_v38 }
 0x10a   : > { %v421_v1 = vsel %vm190_vm3, %v383_v62, 0.0 }
 0x10b   : > { %1297 = vmatmul.msk.f32.vlgmr.msrb.gmra.mxu3 %vm190_vm3, %v1649_v11  ;;  %v353_v11 = vrot.slane %v1565_v39, 1 }
 0x10d   : > { %v354_v33 = vsel %vm316_vm15, %v351_v5, %v353_v11  ;;  %v356_v49 = vsel %vm316_vm15, %v353_v11, %v355_v18  ;;  %v289_v5 = vand.u32 2147483647, %v283_v51  ;;  %v290_v11 = vand.u32 2147483647, %v284_v0 }
 0x10e   : > { %v366_v57 = vsub.f32 %v1551_v35, %v354_v33  ;;  %v367_v6 = vsub.f32 %v1565_v39, %v356_v49  ;;  %v375_v33 = vsub.f32 %v369_v58, %v1717_v30  ;;  %v240_v18 = vsub.f32 %v1597_v48, %v228_v13 }
 0x10f   : > { %v296_v34 = vsel %vm295_vm0, %v289_v5, 0.0  ;;  %v297_v37 = vsel %vm295_vm0, %v290_v11, 0.0  ;;  %v374_v49 = vand.u32 2147483647, %v368_v19  ;;  %v286_v30 = vsub.f32 %v280_v21, %v244_v20 }
 0x110   : > { %v372_v15 = vand.u32 2147483647, %v366_v57  ;;  %v373_v25 = vand.u32 2147483647, %v367_v6  ;;  %v298_v56 = vadd.f32 %v297_v37, %v296_v34  ;;  %v381_v54 = vand.u32 2147483647, %v375_v33 }
 0x111   : > { %v382_v57 = vand.u32 2147483647, %v376_v14  ;;  %v246_v58 = vand.u32 2147483647, %v240_v18  ;;  %v380_v0 = vsub.f32 %v374_v49, %v345_v46  ;;  %v292_v7 = vand.u32 2147483647, %v286_v30 }
 0x112   : > { %v378_v50 = vsub.f32 %v372_v15, %v343_v63  ;;  %v379_v61 = vsub.f32 %v373_v25, %v344_v16  ;;  %v282_v63 = vand.u32 2147483647, %v276_v41  ;;  %v287_v5 = vsub.f32 %v281_v52, %v245_v17 }
 0x113   : > { %v413_v60 = vsel %vm395_vm1, 0.0, %v382_v57  ;;  %v418_v10 = vsel %vm190_vm3, %v381_v54, 0.0  ;;  %v300_v13 = vadd.f32 %v299_v47, %v298_v56  ;;  %v386_v20 = vand.u32 2147483647, %v380_v0 }
 0x114   : > { %v384_v59 = vand.u32 2147483647, %v378_v50  ;;  %v419_v11 = vsel %vm190_vm3, %v413_v60, 0.0  ;;  %v385_v16 = vand.u32 2147483647, %v379_v61  ;;  %v288_v15 = vsub.f32 %v282_v63, %v246_v58 }
 0x115   : > { %v420_v21 = vadd.f32 %v419_v11, %v418_v10  ;;  %v180_v33 = vsub.f32 %v1537_v31, %v1555_v36  ;;  %v182_v14 = vsub.f32 %v1565_v39, %v1583_v44  ;;  %v293_v36 = vand.u32 2147483647, %v287_v5 }
 0x116   : > { %v415_v19 = vsel %vm403_vm2, 0.0, %v384_v59  ;;  %v425_v37 = vsel %vm190_vm3, %v385_v16, 0.0  ;;  %v191_v39 = vsel %vm190_vm3, %v184_v28, 0.0  ;;  %v192_v44 = vsel %vm190_vm3, %v185_v32, 0.0 }
 0x117   : > { %v423_v23 = vsel %vm190_vm3, %v415_v19, 0.0  ;;  %v422_v25 = vadd.f32 %v421_v1, %v420_v21  ;;  %v186_v38 = vand.u32 2147483647, %v180_v33  ;;  %v188_v49 = vand.u32 2147483647, %v182_v14 }
 0x118   : > { %v301_v43 = vsel %vm295_vm0, %v292_v7, 0.0  ;;  %v294_v48 = vand.u32 2147483647, %v288_v15  ;;  %v193_v30 = vadd.f32 %v192_v44, %v191_v39  ;;  %v303_v63 = vsel %vm295_vm0, %v293_v36, 0.0 }
 0x119   : > { %v424_v22 = vadd.f32 %v423_v23, %v422_v25  ;;  %v194_v56 = vsel %vm190_vm3, %v186_v38, 0.0  ;;  %v198_v62 = vsel %vm190_vm3, %v188_v49, 0.0  ;;  %v302_v59 = vadd.f32 %v301_v43, %v300_v13 }
 0x11a   : > { %v195_v58 = vadd.f32 %v194_v56, %v193_v30  ;;  %vm1143_vm1 = vcmp.eq.s32.totalorder %v1498_v2, 0  ;;  %vm1146_vm2 = vcmp.eq.s32.totalorder %v1498_v2, 1 }
 0x11b   : > { %v304_v60 = vadd.f32 %v303_v63, %v302_v59 }
 0x130   : > { %v1695_v8 = vpop.f32.mrf.mxu1 }
 0x131   : > { %v1702_v12 = vmul.f32 %v1695_v8, %v1695_v8 }
 0x138   : > { %v1722_v45 = vpop.f32.mrf.mxu3 }
 0x146   : > { %v1742_v42 = vpop.f32.mrf.mxu3 }
 0x147   : > { %v1747_v51 = vmul.f32 %v1742_v42, %v1742_v42 }
 0x14e   : > { %v936_v17 = vpop.f32.mrf.mxu3 }
 0x14f   : > { %v963_v0 = vsub.f32 %v936_v17, %v1747_v51 }
 0x158   : > { %v793_v55 = vpop.f32.mrf.mxu1 }
 0x159   : > { %v820_v6 = vsub.f32 %v793_v55, %v1702_v12  ;;  %v189_v55 = vand.u32 2147483647, %v183_v24 }
 0x15b   : > { %v200_v5 = vsel %vm190_vm3, %v189_v55, 0.0 }
 0x166   : > { %v1749_v53 = vpop.f32.mrf.mxu2 }
 0x167   : > { %v818_v9 = vmul.f32 %v1749_v53, %v1749_v53  ;;  %v816_v61 = vmul.f32 %v1749_v53, %v1695_v8 }
 0x169   : > { %v827_v3 = vadd.f32 %v818_v9, %v1702_v12  ;;  %v181_v12 = vsub.f32 %v1551_v35, %v1569_v40  ;;  %v428_v35 = vsel %vm427_vm4, %v386_v20, 0.0  ;;  %v426_v40 = vadd.f32 %v425_v37, %v424_v22 }
 0x16a   : > { %v819_v53 = vsub.f32 %v1722_v45, %v816_v61  ;;  %vm1150_vm4 = vcmp.eq.s32.totalorder %v1498_v2, 2 }
 0x16b   : > { %v187_v41 = vand.u32 2147483647, %v181_v12  ;;  %v828_v46 = vadd.f32 0.0001, %v827_v3  ;;  %v429_v52 = vadd.f32 %v428_v35, %v426_v40  ;;  %v822_v3 = vmul.f32 2.0, %v816_v61 }
 0x16c   : > { %v824_v21 = vmul.f32 2.0, %v819_v53 }
 0x16d   : > { %v196_v47 = vsel %vm190_vm3, %v187_v41, 0.0  ;;  %430 = vadd.xlane.f32.xlu2 %v429_v52 }
 0x16e   : > { %v813_v29 = vpop.f32.mrf.mxu2  ;;  %v197_v4 = vadd.f32 %v196_v47, %v195_v58  ;;  %v825_v45 = vadd.f32 0.0009, %v824_v21 }
 0x16f   : > { %v821_v34 = vsub.f32 %v813_v29, %v818_v9  ;;  %v823_v29 = vadd.f32 0.0001, %v822_v3 }
 0x170   : > { %v896_v18 = vpop.f32.mrf.mxu1  ;;  %v199_v8 = vadd.f32 %v198_v62, %v197_v4 }
 0x171   : > { %v829_v31 = vadd.f32 %v821_v34, %v820_v6  ;;  %v961_v57 = vmul.f32 %v896_v18, %v896_v18  ;;  %v305_v6 = vsel %vm295_vm0, %v294_v48, 0.0  ;;  %v959_v27 = vmul.f32 %v896_v18, %v1742_v42 }
 0x172   : > { %v306_v13 = vadd.f32 %v305_v6, %v304_v60  ;;  %v201_v19 = vadd.f32 %v200_v5, %v199_v8  ;;  %v826_v28 = vmul.f32 %v825_v45, %v823_v29 }
 0x173   : > { %v830_v50 = vadd.f32 0.0009, %v829_v31  ;;  %v970_v9 = vadd.f32 %v961_v57, %v1747_v51  ;;  %v965_v42 = vmul.f32 2.0, %v959_v27 }
 0x174   : > { %307 = vadd.xlane.f32.xlu1 %v306_v13  ;;  %202 = vadd.xlane.f32.xlu0 %v201_v19 }
 0x175   : > { %v831_v54 = vmul.f32 %v830_v50, %v828_v46  ;;  %v971_v15 = vadd.f32 0.0001, %v970_v9  ;;  %v966_v40 = vadd.f32 0.0001, %v965_v42 }
 0x176   : > { %v916_v11 = vpop.f32.mrf.mxu2 }
 0x177   : > { %1361 = vrcp.f32 %v831_v54  ;;  %v843_v25 = vand.u32 2147483648, %v831_v54  ;;  %v841_v14 = vand.u32 2147483647, %v831_v54  ;;  %v962_v34 = vsub.f32 %v916_v11, %v959_v27 }
 0x178   : > { %v956_v7 = vpop.f32.mrf.mxu1  ;;  %vm837_vm5 = vweird.f32 %v831_v54 }
 0x179   : > { %v964_v10 = vsub.f32 %v956_v7, %v961_v57  ;;  %v844_v24 = vor.u32 1.1754944e-38, %v843_v25  ;;  %vm842_vm7 = vcmp.eq.f32.partialorder %v841_v14, 8.507059e+37  ;;  %v967_v41 = vmul.f32 2.0, %v962_v34 }
 0x17b   : > { %v972_v16 = vadd.f32 %v964_v10, %v963_v0  ;;  %v968_v50 = vadd.f32 0.0009, %v967_v41 }
 0x17d   : > { %v1362_v1 = vpop.eup %1361  ;;  %v973_v20 = vadd.f32 0.0009, %v972_v16  ;;  %v969_v57 = vmul.f32 %v968_v50, %v966_v40 }
 0x17e   : > { %v833_v23 = vmul.f32 %v1362_v1, %v831_v54  ;;  %v1018_v33 = vpop.f32.mrf.mxu2  ;;  %vm838_vm3 = vweird.f32 %v1362_v1 }
 0x17f   : > { %v974_v26 = vmul.f32 %v973_v20, %v971_v15  ;;  %vm839_vm6 = vmor %vm837_vm5, %vm838_vm3  ;;  %v1102_v49 = vmul.f32 %v1018_v33, %v1018_v33  ;;  %vm1154_vm3 = vcmp.eq.s32.totalorder %v1498_v2, 3 }
 0x180   : > { %v834_v51 = vsub.f32 1.0, %v833_v23 }
 0x181   : > { %1363 = vrcp.f32 %v974_v26  ;;  %v986_v44 = vand.u32 2147483648, %v974_v26  ;;  %v984_v30 = vand.u32 2147483647, %v974_v26  ;;  %vm980_vm10 = vweird.f32 %v974_v26  ;;  %v1058_v5 = vpop.f32.mrf.mxu1 }
 0x182   : > { %v835_v12 = vmul.f32 %v1362_v1, %v834_v51 }
 0x183   : > { %v987_v54 = vor.u32 1.1754944e-38, %v986_v44  ;;  %vm985_vm12 = vcmp.eq.f32.partialorder %v984_v30, 8.507059e+37 }
 0x184   : > { %v836_v37 = vadd.f32 %v1362_v1, %v835_v12 }
 0x186   : > { %v1038_v22 = vpop.f32.mrf.mxu3  ;;  %v840_v32 = vsel %vm839_vm6, %v1362_v1, %v836_v37  ;;  %v1078_v43 = vpop.f32.mrf.mxu2 }
 0x187   : > { %v1364_v38 = vpop.eup %1363  ;;  %v845_v18 = vsel %vm842_vm7, %v844_v24, %v840_v32  ;;  %v1103_v39 = vmul.f32 %v1038_v22, %v1038_v22  ;;  %v1105_v56 = vsub.f32 %v1078_v43, %v1102_v49  ;;  %v1101_v7 = vmul.f32 %v1038_v22, %v1018_v33 }
 0x188   : > { %v846_v46 = vmul.f32 %v845_v18, %v826_v28  ;;  %v976_v31 = vmul.f32 %v1364_v38, %v974_v26  ;;  %vm981_vm9 = vweird.f32 %v1364_v38 }
 0x189   : > { %v1112_v55 = vadd.f32 %v1103_v39, %v1102_v49  ;;  %vm982_vm11 = vmor %vm980_vm10, %vm981_vm9  ;;  %v1104_v60 = vsub.f32 %v1058_v5, %v1101_v7  ;;  %v1107_v53 = vmul.f32 2.0, %v1101_v7 }
 0x18a   : > { %v848_v36 = vsel %vm847_vm8, %v846_v46, 0.0  ;;  %v977_v35 = vsub.f32 1.0, %v976_v31 }
 0x18b   : > { %849 = vadd.xlane.f32.xlu2 %v848_v36  ;;  %v1113_v63 = vadd.f32 0.0001, %v1112_v55  ;;  %v1109_v10 = vmul.f32 2.0, %v1104_v60  ;;  %v1108_v3 = vadd.f32 0.0001, %v1107_v53 }
 0x18c   : > { %v978_v48 = vmul.f32 %v1364_v38, %v977_v35 }
 0x18d   : > { %v1110_v16 = vadd.f32 0.0009, %v1109_v10 }
 0x18e   : > { %v1098_v17 = vpop.f32.mrf.mxu3  ;;  %v979_v52 = vadd.f32 %v1364_v38, %v978_v48 }
 0x18f   : > { %v1106_v47 = vsub.f32 %v1098_v17, %v1103_v39  ;;  %v1111_v21 = vmul.f32 %v1110_v16, %v1108_v3 }
 0x190   : > { %v983_v58 = vsel %vm982_vm11, %v1364_v38, %v979_v52 }
 0x191   : > { %v1114_v61 = vadd.f32 %v1106_v47, %v1105_v56  ;;  %v988_v62 = vsel %vm985_vm12, %v987_v54, %v983_v58 }
 0x192   : > { %v989_v59 = vmul.f32 %v988_v62, %v969_v57 }
 0x193   : > { %v1115_v0 = vadd.f32 0.0009, %v1114_v61 }
 0x194   : > { %v990_v4 = vsel %vm847_vm8, %v989_v59, 0.0 }
 0x195   : > { %v1116_v6 = vmul.f32 %v1115_v0, %v1113_v63  ;;  %991 = vadd.xlane.f32.xlu0 %v990_v4 }
 0x197   : > { %1365 = vrcp.f32 %v1116_v6  ;;  %v1128_v13 = vand.u32 2147483648, %v1116_v6  ;;  %v1126_v1 = vand.u32 2147483647, %v1116_v6  ;;  %vm1122_vm14 = vweird.f32 %v1116_v6 }
 0x199   : > { %v1129_v20 = vor.u32 1.1754944e-38, %v1128_v13  ;;  %vm1127_vm0 = vcmp.eq.f32.partialorder %v1126_v1, 8.507059e+37 }
 0x19d   : > { %v1366_v9 = vpop.eup %1365 }
 0x19e   : > { %v1118_v8 = vmul.f32 %v1366_v9, %v1116_v6  ;;  %vm1123_vm13 = vweird.f32 %v1366_v9 }
 0x19f   : > { %vm1124_vm15 = vmor %vm1122_vm14, %vm1123_vm13 }
 0x1a0   : > { %v1119_v11 = vsub.f32 1.0, %v1118_v8 }
 0x1a2   : > { %v1120_v19 = vmul.f32 %v1366_v9, %v1119_v11 }
 0x1a4   : > { %v1121_v15 = vadd.f32 %v1366_v9, %v1120_v19 }
 0x1a6   : > { %v1125_v23 = vsel %vm1124_vm15, %v1366_v9, %v1121_v15 }
 0x1a7   : > { %v1130_v26 = vsel %vm1127_vm0, %v1129_v20, %v1125_v23 }
 0x1a8   : > { %v1131_v27 = vmul.f32 %v1130_v26, %v1111_v21 }
 0x1aa   : > { %v1132_v51 = vsel %vm847_vm8, %v1131_v27, 0.0 }
 0x1ab   : > { %1133 = vadd.xlane.f32.xlu1 %v1132_v51 }
 0x1e0   : > { %v431_v29 = vpop.xlane.xlu2 %430 }
 0x1e1   : > { %v432_v25 = vrot.slane %v431_v29, 4 }
 0x1e3   : > { %v433_v45 = vadd.f32 %v432_v25, %v431_v29 }
 0x1e5   : > { %v434_v33 = vrot.slane %v433_v45, 2 }
 0x1e7   : > { %v308_v12 = vpop.xlane.xlu1 %307  ;;  %v203_v14 = vpop.xlane.xlu0 %202  ;;  %v435_v22 = vadd.f32 %v434_v33, %v433_v45 }
 0x1e8   : > { %v309_v34 = vrot.slane %v308_v12, 4  ;;  %v204_v37 = vrot.slane %v203_v14, 4 }
 0x1e9   : > { %v436_v41 = vrot.slane %v435_v22, 1 }
 0x1ea   : > { %v310_v24 = vadd.f32 %v309_v34, %v308_v12  ;;  %v205_v28 = vadd.f32 %v204_v37, %v203_v14 }
 0x1eb   : > { %v437_v40 = vadd.f32 %v436_v41, %v435_v22 }
 0x1ec   : > { %v311_v32 = vrot.slane %v310_v24, 2  ;;  %v206_v38 = vrot.slane %v205_v28, 2 }
 0x1ee   : > { %v312_v42 = vadd.f32 %v311_v32, %v310_v24  ;;  %v207_v18 = vadd.f32 %v206_v38, %v205_v28 }
 0x1f0   : > { %v313_v46 = vrot.slane %v312_v42, 1  ;;  %v208_v31 = vrot.slane %v207_v18, 1 }
 0x1f2   : > { %v314_v36 = vadd.f32 %v313_v46, %v312_v42  ;;  %v209_v35 = vadd.f32 %v208_v31, %v207_v18 }
 0x1f4   : > { %1308 = vpush %v209_v35 }
 0x1f5   : > { %1310 = vpush %v314_v36 }
 0x1f6   : > { %1312 = vpush %v437_v40 }
 0x1fe   : > { %v850_v49 = vpop.xlane.xlu2 %849 }
 0x1ff   : > { %v851_v39 = vrot.slane %v850_v49, 4 }
 0x201   : > { %v852_v44 = vadd.f32 %v851_v39, %v850_v49 }
 0x203   : > { %v853_v50 = vrot.slane %v852_v44, 2 }
 0x205   : > { %v854_v43 = vadd.f32 %v853_v50, %v852_v44 }
 0x207   : > { %v855_v48 = vrot.slane %v854_v43, 1 }
 0x208   : > { %v992_v30 = vpop.xlane.xlu0 %991 }
 0x209   : > { %v993_v17 = vrot.slane %v992_v30, 4  ;;  %v856_v52 = vadd.f32 %v855_v48, %v854_v43 }
 0x20b   : > { %v994_v55 = vadd.f32 %v993_v17, %v992_v30  ;;  %1314 = vpush %v856_v52 }
 0x20d   : > { %v995_v56 = vrot.slane %v994_v55, 2 }
 0x20f   : > { %v996_v47 = vadd.f32 %v995_v56, %v994_v55 }
 0x211   : > { %v997_v54 = vrot.slane %v996_v47, 1 }
 0x213   : > { %v998_v57 = vadd.f32 %v997_v54, %v996_v47 }
 0x215   : > { %1316 = vpush %v998_v57 }
 0x21e   : > { %v1134_v58 = vpop.xlane.xlu1 %1133 }
 0x21f   : > { %v1135_v61 = vrot.slane %v1134_v58, 4 }
 0x221   : > { %v1136_v62 = vadd.f32 %v1135_v61, %v1134_v58 }
 0x223   : > { %v1137_v59 = vrot.slane %v1136_v62, 2 }
 0x225   : > { %v1138_v63 = vadd.f32 %v1137_v59, %v1136_v62  ;;  %s1309_s30 = spop %1308 }
 0x226   : > { %s1311_s3 = spop %1310  ;;  %v1144_v6 = vstv %s1309_s30 }
 0x227   : > { %v1139_v0 = vrot.slane %v1138_v63, 1  ;;  %v1147_v7 = vstv %s1311_s3  ;;  %s1313_s5 = spop %1312  ;;  %v1145_v5 = vsel %vm1143_vm1, %v1144_v6, 0.0 }
 0x228   : > { %v1148_v60 = vsel %vm1146_vm2, %v1147_v7, 0.0  ;;  %v1151_v9 = vstv %s1313_s5  ;;  %s1387_s5 = scalar_lea.hbm %s1836_s2, 16 }
 0x229   : > { %v1140_v4 = vadd.f32 %v1139_v0, %v1138_v63  ;;  %v1149_v10 = vadd.f32 %v1148_v60, %v1145_v5  ;;  %v1152_v8 = vsel %vm1150_vm4, %v1151_v9, 0.0  ;;  %p1389_p1 = scmp.lt.s32.totalorder %s1387_s5, %s1383_s29 }
 0x22b   : > { %1318 = vpush %v1140_v4  ;;  %v1153_v53 = vadd.f32 %v1152_v8, %v1149_v10  ;;  %p1390_p2 = por %p1389_p1, %p1388_p0 }
 0x22d   : > { %p1391_p3 = pnand %p1390_p2, %p1386_p13 }
 0x23c   : > { %s1315_s6 = spop %1314 }
 0x246   : > { %s1317_s8 = spop %1316 }
 0x247   : > { %s1000_s16 = sadd.f32 %s1317_s8, %s1315_s6 }
 0x25c   : > { %s1319_s23 = spop %1318 }
 0x25d   : > { %s1142_s24 = sadd.f32 %s1319_s23, %s1000_s16 }
 0x25f   : > { %v1155_v11 = vstv %s1142_s24 }
 0x260   : > { %v1156_v13 = vsel %vm1154_vm3, %v1155_v11, 0.0 }
 0x261   : > { %v1157_v16 = vadd.f32 %v1156_v13, %v1153_v53 }
 0x263   : > { %1158 = vst [vmem:[%s153_s25] sm:$0xff] %v1157_v16 }
 0x264   : > { %1394 = shalt.err (!%p1391_p3)
}
 0x265   : > { %1320 = dma.vmem_to_hbm [thread:$0]  (%p1486_p5), %s1173_s26, 128, %s1175_s27, %s1160_s13  }
 0x266 PF: > { %p1326_p4 = scmp.ge.s32.totalorder %s1429_s12, 2  ;;  %s1186_s4 = sand.u32 1, %s1417_s9  }
 0x267   : > { %s1187_s8 = scalar_lea.sflag [#allocation3], %s1186_s4 }
 0x268   : > { %p1323_p7 = pnand %p1326_p4, %p1490_p6 }
 0x26a   : > { %p1324_p8 = pneg %p1323_p7 }
 0x26c   : > { %1412 = dma.done.wait (%p1324_p8), %s1187_s8, 128  }
 0x26d   : > { %1414 = vsyncadd (%p1324_p8), %s1187_s8, 4294967168  ;;  %p12_p9 = scmp.ge.s32.totalorder %s1473_s15, 4   ;;  %s1839_s9 = smov %s1421_s10 }
 0x26e   : > { %s1840_s10 = smov %s1425_s11  ;;  %s1841_s11 = smov %s1484_s18 }
 0x26f   : > { %s1842_s12 = smov %s1473_s15  ;;  %14 = sbr.rel (!%p12_p9) target bundleno = 3 (0x3), region = 66 }
 0x274   :  { %1193 = vsyncpa [#allocation3], 1 }
 0x275   :  { %1195 = vsyncpa [#allocation3 + $0x1], 1 }

</bundles_post_ra>
